<compile_context>
chip_gen: v6e
topology: v6e:2x2x1
jax: 0.10.0
libtpu: 0.0.40
codegen_flags: <defaults>
</compile_context>

<pallas_src>
import functools

import jax
import jax.numpy as jnp
import numpy as np
from jax.experimental import pallas as pl
from jax.experimental.pallas import tpu as pltpu


def m3d2_kernel(x_ref, mask_ref, w1_ref, w2_ref, w3_ref, o_ref, oacc_ref,
                *, T, Tt, H, W):
    # x_ref:    (Cin, L)        bf16, lane-dense frames [i*Tt, i*Tt+Tt)
    # mask_ref: (9, L)          f32 0/1 spatial-tap validity per lane
    # w1_ref:   (C, Cin)        bf16 conv1
    # w2_ref:   (9, C, C)       f32 conv2 taps (tap-major: 3*ky+kx)
    # w3_ref:   (5*Cout, C)     bf16 fused conv3 o (id + conv_tem1 + conv_tem2)
    # o_ref:    (Cout, T*HW)    f32 output (whole sample, resident over tiles)
    # oacc_ref: (Cout, (T+4)*HW) f32 accumulator with 2-frame halo each side
    HW = H * W
    L = Tt * HW
    n_tt = T // Tt
    C = w1_ref.shape[0]
    Cout = o_ref.shape[0]
    i = pl.program_id(1)

    # Fresh sample: zero the halo-extended accumulator.
    @pl.when(i == 0)
    def _():
        oacc_ref[...] = jnp.zeros_like(oacc_ref)

    x_bf = x_ref[...]                                        # (Cin, L) bf16

    # ---- Stage 1a: conv1 (1x1x1) -- one streaming bf16 matmul -> f32 ------
    h1 = jnp.dot(w1_ref[...], x_bf,
                 preferred_element_type=jnp.float32)         # (C, L) f32

    # ---- Stage 1b: conv2 (1x3x3, pad 1): taps via pltpu.roll + masks -------
    # Spatial shifts never leave the frame for any unmasked output lane, so
    # no inter-tile halo is needed for this stage.
    h2 = jnp.zeros((C, L), jnp.float32)
    for ky in range(3):
        for kx in range(3):
            dy, dx = ky - 1, kx - 1
            k = 3 * ky + kx
            s = dy * W + dx                                  # lane shift
            if s == 0:
                tap = h1
            else:
                # want tap[p] = h1[p + s]; jnp.roll convention -> shift = -s
                tap = pltpu.roll(h1, (-s) % L, axis=1)
                tap = tap * mask_ref[k:k + 1, :]             # zero invalid lanes
            h2 = h2 + jnp.dot(w2_ref[k], tap,
                              preferred_element_type=jnp.float32)

    # ---- Stage 2: (id + conv_tem1 + conv_tem2) folded into conv3 -----------
    # One (5*Cout, C) matmul; temporal tap j is scattered to output frames
    # shifted by (2 - j), landing inside the accumulator's 2-frame halo.
    y = jnp.dot(w3_ref[...], h2.astype(jnp.bfloat16),
                preferred_element_type=jnp.float32)          # (5*Cout, L)
    base = i * L
    for j in range(5):
        off = pl.multiple_of(base + (4 - j) * HW, 128)
        cur = oacc_ref[:, pl.ds(off, L)]
        oacc_ref[:, pl.ds(off, L)] = cur + y[j * Cout:(j + 1) * Cout, :]

    # Residual: x adds straight onto its own output frames (+2 halo offset).
    roff = pl.multiple_of(base + 2 * HW, 128)
    oacc_ref[:, pl.ds(roff, L)] = (oacc_ref[:, pl.ds(roff, L)]
                                   + x_bf.astype(jnp.float32))

    # ---- Finalize: last frame tile applies leaky_relu and writes output ----
    @pl.when(i == pl.num_programs(1) - 1)
    def _():
        for fc in range(n_tt):                               # chunked store
            a = oacc_ref[:, 2 * HW + fc * L: 2 * HW + (fc + 1) * L]
            o_ref[:, fc * L:(fc + 1) * L] = jnp.where(a > 0, a, 0.01 * a)


def _pick_frame_tile(T, HW, target_lanes=2048, min_tiles=4):
    """Largest divisor Tt of T with Tt*HW <= target_lanes and T/Tt >= min_tiles."""
    best = 1
    for tt in range(1, T + 1):
        if T % tt:
            continue
        if tt * HW <= target_lanes and (T // tt) >= min(min_tiles, T):
            best = tt
    return best


def m3d2_forward(x, W1, W2, Wt1, Wt2, W3):
    """x: (N, Cin, T, H, W) f32; weights in PyTorch (O, I, kT, kH, kW) layout.

    All convs in M3D_2 are bias=False, so the algebraic fusion is exact.
    """
    N, Cin, T, H, Wd = x.shape
    C = W1.shape[0]                       # = Cin // 2
    Cout = W3.shape[0]
    assert Cout == Cin, "residual add requires out_channels == in_channels"
    HW = H * Wd
    assert HW % 128 == 0, "H*W must be a multiple of 128 for lane-dense tiling"
    M = T * HW

    Tt = _pick_frame_tile(T, HW)
    n_tt = T // Tt
    L = Tt * HW

    f32, bf16 = jnp.float32, jnp.bfloat16
    hi = jax.lax.Precision.HIGHEST

    # ---- weights -----------------------------------------------------------
    w1m = W1[:, :, 0, 0, 0].astype(bf16)                       # (C, Cin)
    # conv2 taps, tap-major: w2t[3*ky+kx] = W2[:, :, 0, ky, kx]  -> (C, C)
    w2t = jnp.transpose(W2[:, :, 0, :, :].astype(f32),
                        (2, 3, 0, 1)).reshape(9, C, C)
    # (id + conv_tem1 + conv_tem2) folded into conv3: 5 temporal taps
    w3m = W3[:, :, 0, 0, 0].astype(f32)                        # (Cout, C)
    wt1m = Wt1[:, :, :, 0, 0].astype(f32)                      # (C, C, 3)
    wt2m = Wt2[:, :, :, 0, 0].astype(f32)                      # (C, C, 5)
    A = jnp.zeros((5, C, C), f32)
    A = A.at[2].add(jnp.eye(C, dtype=f32))
    A = A.at[1:4].add(jnp.transpose(wt1m, (2, 0, 1)))          # 3-tap, pad 1
    A = A.at[:].add(jnp.transpose(wt2m, (2, 0, 1)))            # 5-tap, pad 2
    w3f = jnp.einsum('po,joc->jpc', w3m, A, precision=hi)      # (5, Cout, C)
    w3all = w3f.reshape(5 * Cout, C).astype(bf16)

    # ---- per-lane spatial-tap validity masks (static, one frame tile) ------
    hh = np.arange(H)[:, None]
    ww = np.arange(Wd)[None, :]
    masks = []
    for ky in range(3):
        for kx in range(3):
            dy, dx = ky - 1, kx - 1
            mk = ((hh + dy >= 0) & (hh + dy < H)
                  & (ww + dx >= 0) & (ww + dx < Wd))
            masks.append(np.tile(mk.reshape(-1), Tt))
    tapmask = jnp.asarray(np.stack(masks).astype(np.float32))  # (9, L)

    # ---- lane-dense bf16 input: channels x flattened (t, h, w) -------------
    x_bf = x.astype(bf16).reshape(N, Cin, M)

    # ---- explicit VMEM budget (bounded below v7x's 64 MiB physical) --------
    est = (2 * Cin * L * 2                 # x tile, double buffered (bf16)
           + 2 * 9 * L * 4                 # tap masks
           + 2 * Cout * M * 4              # resident output block (+ buffer)
           + Cout * (T + 4) * HW * 4       # halo-extended accumulator scratch
           + 16 * C * L * 4)               # in-flight values (h1/h2/taps/y)
    vmem_limit = int(min(max(2 * est, 32 * 1024 * 1024), 56 * 1024 * 1024))

    kernel = functools.partial(m3d2_kernel, T=T, Tt=Tt, H=H, W=Wd)
    out = pl.pallas_call(
        kernel,
        out_shape=jax.ShapeDtypeStruct((N, Cout, M), f32),
        grid_spec=pltpu.PrefetchScalarGridSpec(
            num_scalar_prefetch=0,
            grid=(N, n_tt),
            in_specs=[
                pl.BlockSpec((None, Cin, L), lambda b, i: (b, 0, i)),
                pl.BlockSpec((9, L), lambda b, i: (0, 0)),
                pl.BlockSpec((C, Cin), lambda b, i: (0, 0)),
                pl.BlockSpec((9, C, C), lambda b, i: (0, 0, 0)),
                pl.BlockSpec((5 * Cout, C), lambda b, i: (0, 0)),
            ],
            out_specs=pl.BlockSpec((None, Cout, M), lambda b, i: (b, 0, 0)),
            scratch_shapes=[pltpu.VMEM((Cout, (T + 4) * HW), f32)],
        ),
        compiler_params=pltpu.CompilerParams(
            dimension_semantics=("parallel", "arbitrary"),
            vmem_limit_bytes=vmem_limit),
    )(x_bf, tapmask, w1m, w2t, w3all)

    # (N, Cout, M) with M flattened (t, h, w) -> NCDHW directly
    return out.reshape(N, Cout, T, H, Wd)


def m3d2_reference(x, W1, W2, Wt1, Wt2, W3):
    """Pure-JAX reference (NCDHW, cross-correlation = PyTorch conv)."""
    def conv3d(inp, w, pad):
        return jax.lax.conv_general_dilated(
            inp, w, window_strides=(1, 1, 1), padding=pad,
            dimension_numbers=('NCDHW', 'OIDHW', 'NCDHW'),
            precision=jax.lax.Precision.HIGHEST)
    h1 = conv3d(x, W1, [(0, 0), (0, 0), (0, 0)])
    h2 = conv3d(h1, W2, [(0, 0), (1, 1), (1, 1)])
    t1 = conv3d(h2, Wt1, [(1, 1), (0, 0), (0, 0)])
    t2 = conv3d(h2, Wt2, [(2, 2), (0, 0), (0, 0)])
    h3 = conv3d(h2 + t1 + t2, W3, [(0, 0), (0, 0), (0, 0)])
    y = x + h3
    return jnp.where(y > 0, y, 0.01 * y)


if __name__ == "__main__":
    # small shapes consistent with the module: in_channels=8 -> channels=4
    N, Cin, T, H, W = 2, 8, 8, 16, 16
    C = Cin // 2
    Cout = Cin

    key = jax.random.PRNGKey(0)
    kx, k1, k2, k3, k4, k5 = jax.random.split(key, 6)
    x = jax.random.normal(kx, (N, Cin, T, H, W), jnp.float32)
    W1 = 0.1 * jax.random.normal(k1, (C, Cin, 1, 1, 1), jnp.float32)
    W2 = 0.1 * jax.random.normal(k2, (C, C, 1, 3, 3), jnp.float32)
    Wt1 = 0.1 * jax.random.normal(k3, (C, C, 3, 1, 1), jnp.float32)
    Wt2 = 0.1 * jax.random.normal(k4, (C, C, 5, 1, 1), jnp.float32)
    W3 = 0.1 * jax.random.normal(k5, (Cout, C, 1, 1, 1), jnp.float32)

    fwd = jax.jit(m3d2_forward)
    y = jax.block_until_ready(fwd(x, W1, W2, Wt1, Wt2, W3))

    y_ref = jax.block_until_ready(m3d2_reference(x, W1, W2, Wt1, Wt2, W3))
    # bf16-operand path (f32 accumulate): tolerance re-baselined per review.
    np.testing.assert_allclose(np.asarray(y), np.asarray(y_ref),
                               rtol=2e-2, atol=2e-2)
    print("KERNEL_OK")
</pallas_src>

<mosaic_0001>
module attributes {stable_mosaic.version = 11 : i64} {
  func.func @m3d2_kernel(%arg0: i32, %arg1: i32, %arg2: memref<1x8x512xbf16, #tpu.memory_space<vmem>>, %arg3: memref<9x512xf32, #tpu.memory_space<vmem>>, %arg4: memref<4x8xbf16, #tpu.memory_space<vmem>>, %arg5: memref<9x4x4xf32, #tpu.memory_space<vmem>>, %arg6: memref<40x4xbf16, #tpu.memory_space<vmem>>, %arg7: memref<1x8x2048xf32, #tpu.memory_space<vmem>>, %arg8: memref<8x3072xf32, #tpu.memory_space<vmem>>) attributes {dimension_semantics = [#tpu.dimension_semantics<parallel>, #tpu.dimension_semantics<arbitrary>], iteration_bounds = array<i64: 2, 4>, scalar_prefetch = 0 : i64, scratch_operands = 1 : i64, tpu.core_type = #tpu.core_type<tc>, window_params = [{transform_indices = @transform_0, window_bounds = array<i64: 1, 8, 512>}, {pipeline_mode = #tpu.pipeline_mode<synchronous>, transform_indices = @transform_1, window_bounds = array<i64: 9, 512>}, {pipeline_mode = #tpu.pipeline_mode<synchronous>, transform_indices = @transform_2, window_bounds = array<i64: 4, 8>}, {pipeline_mode = #tpu.pipeline_mode<synchronous>, transform_indices = @transform_3, window_bounds = array<i64: 9, 4, 4>}, {pipeline_mode = #tpu.pipeline_mode<synchronous>, transform_indices = @transform_4, window_bounds = array<i64: 40, 4>}, {transform_indices = @transform_5, window_bounds = array<i64: 1, 8, 2048>}]} {
    %c0_i32 = arith.constant 0 : i32
    %0 = arith.cmpi eq, %arg1, %c0_i32 : i32
    %1 = arith.extui %0 : i1 to i32
    %c0_i32_0 = arith.constant 0 : i32
    %2 = arith.cmpi ne, %1, %c0_i32_0 : i32
    scf.if %2 {
      %cst_69 = arith.constant 0.000000e+00 : f32
      %131 = vector.broadcast %cst_69 : f32 to vector<8x3072xf32>
      %c0_70 = arith.constant 0 : index
      %c0_71 = arith.constant 0 : index
      %132 = vector.load %arg8[%c0_70, %c0_71] : memref<8x3072xf32, #tpu.memory_space<vmem>>, vector<8x3072xf32>
      tpu.vector_store %arg8[%c0_70, %c0_71], %131 {strides = array<i32>} : memref<8x3072xf32, #tpu.memory_space<vmem>>, vector<8x3072xf32>,
    } else {
    }
    %c0 = arith.constant 0 : index
    %c0_1 = arith.constant 0 : index
    %c0_2 = arith.constant 0 : index
    %3 = vector.load %arg2[%c0, %c0_1, %c0_2] : memref<1x8x512xbf16, #tpu.memory_space<vmem>>, vector<1x8x512xbf16>
    %4 = vector.shape_cast %3 : vector<1x8x512xbf16> to vector<8x512xbf16>
    %c0_3 = arith.constant 0 : index
    %c0_4 = arith.constant 0 : index
    %5 = vector.load %arg4[%c0_3, %c0_4] : memref<4x8xbf16, #tpu.memory_space<vmem>>, vector<4x8xbf16>
    %cst = arith.constant dense<0.000000e+00> : vector<4x512xf32>
    %6 = tpu.matmul %5, %4, %cst {dimension_numbers = #tpu.dot_dimension_numbers<[1], [0], [0], [1], [0, 0, 1, 1], [], []>} : vector<4x8xbf16>, vector<8x512xbf16>, vector<4x512xf32> -> vector<4x512xf32>
    %cst_5 = arith.constant 0.000000e+00 : f32
    %7 = vector.broadcast %cst_5 : f32 to vector<4x512xf32>
    %c17_i32 = arith.constant 17 : i32
    %8 = tpu.dynamic_rotate %6 by %c17_i32 dim 1 : vector<4x512xf32>, i32 -> vector<4x512xf32>
    %c0_6 = arith.constant 0 : index
    %c0_7 = arith.constant 0 : index
    %9 = vector.load %arg3[%c0_6, %c0_7] : memref<9x512xf32, #tpu.memory_space<vmem>>, vector<1x512xf32>
    %10 = vector.broadcast %9 : vector<1x512xf32> to vector<4x512xf32>
    %11 = arith.mulf %8, %10 : vector<4x512xf32>
    %c0_8 = arith.constant 0 : index
    %c0_9 = arith.constant 0 : index
    %c0_10 = arith.constant 0 : index
    %12 = vector.load %arg5[%c0_8, %c0_9, %c0_10] : memref<9x4x4xf32, #tpu.memory_space<vmem>>, vector<1x4x4xf32>
    %13 = vector.shape_cast %12 : vector<1x4x4xf32> to vector<4x4xf32>
    %cst_11 = arith.constant dense<0.000000e+00> : vector<4x512xf32>
    %14 = tpu.matmul %13, %11, %cst_11 {dimension_numbers = #tpu.dot_dimension_numbers<[1], [0], [0], [1], [0, 0, 1, 1], [], []>} : vector<4x4xf32>, vector<4x512xf32>, vector<4x512xf32> -> vector<4x512xf32>
    %15 = arith.addf %7, %14 : vector<4x512xf32>
    %c16_i32 = arith.constant 16 : i32
    %16 = tpu.dynamic_rotate %6 by %c16_i32 dim 1 : vector<4x512xf32>, i32 -> vector<4x512xf32>
    %c1 = arith.constant 1 : index
    %c0_12 = arith.constant 0 : index
    %17 = vector.load %arg3[%c1, %c0_12] : memref<9x512xf32, #tpu.memory_space<vmem>>, vector<1x512xf32>
    %18 = vector.broadcast %17 : vector<1x512xf32> to vector<4x512xf32>
    %19 = arith.mulf %16, %18 : vector<4x512xf32>
    %c1_13 = arith.constant 1 : index
    %c0_14 = arith.constant 0 : index
    %c0_15 = arith.constant 0 : index
    %20 = vector.load %arg5[%c1_13, %c0_14, %c0_15] : memref<9x4x4xf32, #tpu.memory_space<vmem>>, vector<1x4x4xf32>
    %21 = vector.shape_cast %20 : vector<1x4x4xf32> to vector<4x4xf32>
    %cst_16 = arith.constant dense<0.000000e+00> : vector<4x512xf32>
    %22 = tpu.matmul %21, %19, %cst_16 {dimension_numbers = #tpu.dot_dimension_numbers<[1], [0], [0], [1], [0, 0, 1, 1], [], []>} : vector<4x4xf32>, vector<4x512xf32>, vector<4x512xf32> -> vector<4x512xf32>
    %23 = arith.addf %15, %22 : vector<4x512xf32>
    %c15_i32 = arith.constant 15 : i32
    %24 = tpu.dynamic_rotate %6 by %c15_i32 dim 1 : vector<4x512xf32>, i32 -> vector<4x512xf32>
    %c2 = arith.constant 2 : index
    %c0_17 = arith.constant 0 : index
    %25 = vector.load %arg3[%c2, %c0_17] : memref<9x512xf32, #tpu.memory_space<vmem>>, vector<1x512xf32>
    %26 = vector.broadcast %25 : vector<1x512xf32> to vector<4x512xf32>
    %27 = arith.mulf %24, %26 : vector<4x512xf32>
    %c2_18 = arith.constant 2 : index
    %c0_19 = arith.constant 0 : index
    %c0_20 = arith.constant 0 : index
    %28 = vector.load %arg5[%c2_18, %c0_19, %c0_20] : memref<9x4x4xf32, #tpu.memory_space<vmem>>, vector<1x4x4xf32>
    %29 = vector.shape_cast %28 : vector<1x4x4xf32> to vector<4x4xf32>
    %cst_21 = arith.constant dense<0.000000e+00> : vector<4x512xf32>
    %30 = tpu.matmul %29, %27, %cst_21 {dimension_numbers = #tpu.dot_dimension_numbers<[1], [0], [0], [1], [0, 0, 1, 1], [], []>} : vector<4x4xf32>, vector<4x512xf32>, vector<4x512xf32> -> vector<4x512xf32>
    %31 = arith.addf %23, %30 : vector<4x512xf32>
    %c1_i32 = arith.constant 1 : i32
    %32 = tpu.dynamic_rotate %6 by %c1_i32 dim 1 : vector<4x512xf32>, i32 -> vector<4x512xf32>
    %c3 = arith.constant 3 : index
    %c0_22 = arith.constant 0 : index
    %33 = vector.load %arg3[%c3, %c0_22] : memref<9x512xf32, #tpu.memory_space<vmem>>, vector<1x512xf32>
    %34 = vector.broadcast %33 : vector<1x512xf32> to vector<4x512xf32>
    %35 = arith.mulf %32, %34 : vector<4x512xf32>
    %c3_23 = arith.constant 3 : index
    %c0_24 = arith.constant 0 : index
    %c0_25 = arith.constant 0 : index
    %36 = vector.load %arg5[%c3_23, %c0_24, %c0_25] : memref<9x4x4xf32, #tpu.memory_space<vmem>>, vector<1x4x4xf32>
    %37 = vector.shape_cast %36 : vector<1x4x4xf32> to vector<4x4xf32>
    %cst_26 = arith.constant dense<0.000000e+00> : vector<4x512xf32>
    %38 = tpu.matmul %37, %35, %cst_26 {dimension_numbers = #tpu.dot_dimension_numbers<[1], [0], [0], [1], [0, 0, 1, 1], [], []>} : vector<4x4xf32>, vector<4x512xf32>, vector<4x512xf32> -> vector<4x512xf32>
    %39 = arith.addf %31, %38 : vector<4x512xf32>
    %c4 = arith.constant 4 : index
    %c0_27 = arith.constant 0 : index
    %c0_28 = arith.constant 0 : index
    %40 = vector.load %arg5[%c4, %c0_27, %c0_28] : memref<9x4x4xf32, #tpu.memory_space<vmem>>, vector<1x4x4xf32>
    %41 = vector.shape_cast %40 : vector<1x4x4xf32> to vector<4x4xf32>
    %cst_29 = arith.constant dense<0.000000e+00> : vector<4x512xf32>
    %42 = tpu.matmul %41, %6, %cst_29 {dimension_numbers = #tpu.dot_dimension_numbers<[1], [0], [0], [1], [0, 0, 1, 1], [], []>} : vector<4x4xf32>, vector<4x512xf32>, vector<4x512xf32> -> vector<4x512xf32>
    %43 = arith.addf %39, %42 : vector<4x512xf32>
    %c511_i32 = arith.constant 511 : i32
    %44 = tpu.dynamic_rotate %6 by %c511_i32 dim 1 : vector<4x512xf32>, i32 -> vector<4x512xf32>
    %c5 = arith.constant 5 : index
    %c0_30 = arith.constant 0 : index
    %45 = vector.load %arg3[%c5, %c0_30] : memref<9x512xf32, #tpu.memory_space<vmem>>, vector<1x512xf32>
    %46 = vector.broadcast %45 : vector<1x512xf32> to vector<4x512xf32>
    %47 = arith.mulf %44, %46 : vector<4x512xf32>
    %c5_31 = arith.constant 5 : index
    %c0_32 = arith.constant 0 : index
    %c0_33 = arith.constant 0 : index
    %48 = vector.load %arg5[%c5_31, %c0_32, %c0_33] : memref<9x4x4xf32, #tpu.memory_space<vmem>>, vector<1x4x4xf32>
    %49 = vector.shape_cast %48 : vector<1x4x4xf32> to vector<4x4xf32>
    %cst_34 = arith.constant dense<0.000000e+00> : vector<4x512xf32>
    %50 = tpu.matmul %49, %47, %cst_34 {dimension_numbers = #tpu.dot_dimension_numbers<[1], [0], [0], [1], [0, 0, 1, 1], [], []>} : vector<4x4xf32>, vector<4x512xf32>, vector<4x512xf32> -> vector<4x512xf32>
    %51 = arith.addf %43, %50 : vector<4x512xf32>
    %c497_i32 = arith.constant 497 : i32
    %52 = tpu.dynamic_rotate %6 by %c497_i32 dim 1 : vector<4x512xf32>, i32 -> vector<4x512xf32>
    %c6 = arith.constant 6 : index
    %c0_35 = arith.constant 0 : index
    %53 = vector.load %arg3[%c6, %c0_35] : memref<9x512xf32, #tpu.memory_space<vmem>>, vector<1x512xf32>
    %54 = vector.broadcast %53 : vector<1x512xf32> to vector<4x512xf32>
    %55 = arith.mulf %52, %54 : vector<4x512xf32>
    %c6_36 = arith.constant 6 : index
    %c0_37 = arith.constant 0 : index
    %c0_38 = arith.constant 0 : index
    %56 = vector.load %arg5[%c6_36, %c0_37, %c0_38] : memref<9x4x4xf32, #tpu.memory_space<vmem>>, vector<1x4x4xf32>
    %57 = vector.shape_cast %56 : vector<1x4x4xf32> to vector<4x4xf32>
    %cst_39 = arith.constant dense<0.000000e+00> : vector<4x512xf32>
    %58 = tpu.matmul %57, %55, %cst_39 {dimension_numbers = #tpu.dot_dimension_numbers<[1], [0], [0], [1], [0, 0, 1, 1], [], []>} : vector<4x4xf32>, vector<4x512xf32>, vector<4x512xf32> -> vector<4x512xf32>
    %59 = arith.addf %51, %58 : vector<4x512xf32>
    %c496_i32 = arith.constant 496 : i32
    %60 = tpu.dynamic_rotate %6 by %c496_i32 dim 1 : vector<4x512xf32>, i32 -> vector<4x512xf32>
    %c7 = arith.constant 7 : index
    %c0_40 = arith.constant 0 : index
    %61 = vector.load %arg3[%c7, %c0_40] : memref<9x512xf32, #tpu.memory_space<vmem>>, vector<1x512xf32>
    %62 = vector.broadcast %61 : vector<1x512xf32> to vector<4x512xf32>
    %63 = arith.mulf %60, %62 : vector<4x512xf32>
    %c7_41 = arith.constant 7 : index
    %c0_42 = arith.constant 0 : index
    %c0_43 = arith.constant 0 : index
    %64 = vector.load %arg5[%c7_41, %c0_42, %c0_43] : memref<9x4x4xf32, #tpu.memory_space<vmem>>, vector<1x4x4xf32>
    %65 = vector.shape_cast %64 : vector<1x4x4xf32> to vector<4x4xf32>
    %cst_44 = arith.constant dense<0.000000e+00> : vector<4x512xf32>
    %66 = tpu.matmul %65, %63, %cst_44 {dimension_numbers = #tpu.dot_dimension_numbers<[1], [0], [0], [1], [0, 0, 1, 1], [], []>} : vector<4x4xf32>, vector<4x512xf32>, vector<4x512xf32> -> vector<4x512xf32>
    %67 = arith.addf %59, %66 : vector<4x512xf32>
    %c495_i32 = arith.constant 495 : i32
    %68 = tpu.dynamic_rotate %6 by %c495_i32 dim 1 : vector<4x512xf32>, i32 -> vector<4x512xf32>
    %c8 = arith.constant 8 : index
    %c0_45 = arith.constant 0 : index
    %69 = vector.load %arg3[%c8, %c0_45] : memref<9x512xf32, #tpu.memory_space<vmem>>, vector<1x512xf32>
    %70 = vector.broadcast %69 : vector<1x512xf32> to vector<4x512xf32>
    %71 = arith.mulf %68, %70 : vector<4x512xf32>
    %c8_46 = arith.constant 8 : index
    %c0_47 = arith.constant 0 : index
    %c0_48 = arith.constant 0 : index
    %72 = vector.load %arg5[%c8_46, %c0_47, %c0_48] : memref<9x4x4xf32, #tpu.memory_space<vmem>>, vector<1x4x4xf32>
    %73 = vector.shape_cast %72 : vector<1x4x4xf32> to vector<4x4xf32>
    %cst_49 = arith.constant dense<0.000000e+00> : vector<4x512xf32>
    %74 = tpu.matmul %73, %71, %cst_49 {dimension_numbers = #tpu.dot_dimension_numbers<[1], [0], [0], [1], [0, 0, 1, 1], [], []>} : vector<4x4xf32>, vector<4x512xf32>, vector<4x512xf32> -> vector<4x512xf32>
    %75 = arith.addf %67, %74 : vector<4x512xf32>
    %c0_50 = arith.constant 0 : index
    %c0_51 = arith.constant 0 : index
    %76 = vector.load %arg6[%c0_50, %c0_51] : memref<40x4xbf16, #tpu.memory_space<vmem>>, vector<40x4xbf16>
    %77 = arith.truncf %75 : vector<4x512xf32> to vector<4x512xbf16>
    %cst_52 = arith.constant dense<0.000000e+00> : vector<40x512xf32>
    %78 = tpu.matmul %76, %77, %cst_52 {dimension_numbers = #tpu.dot_dimension_numbers<[1], [0], [0], [1], [0, 0, 1, 1], [], []>} : vector<40x4xbf16>, vector<4x512xbf16>, vector<40x512xf32> -> vector<40x512xf32>
    %c512_i32 = arith.constant 512 : i32
    %79 = arith.muli %arg1, %c512_i32 : i32
    %c1024_i32 = arith.constant 1024 : i32
    %80 = arith.addi %79, %c1024_i32 : i32
    %81 = tpu.assume_multiple %80, 128 : i32
    %c0_53 = arith.constant 0 : index
    %82 = arith.index_cast %81 : i32 to index
    %83 = vector.load %arg8[%c0_53, %82] : memref<8x3072xf32, #tpu.memory_space<vmem>>, vector<8x512xf32>
    %84 = vector.extract_strided_slice %78 {offsets = [0, 0], sizes = [8, 512], strides = [1, 1]} : vector<40x512xf32> to vector<8x512xf32>
    %85 = arith.addf %83, %84 : vector<8x512xf32>
    %c0_54 = arith.constant 0 : index
    %86 = arith.index_cast %81 : i32 to index
    %87 = vector.load %arg8[%c0_54, %86] : memref<8x3072xf32, #tpu.memory_space<vmem>>, vector<8x512xf32>
    tpu.vector_store %arg8[%c0_54, %86], %85 {strides = array<i32>} : memref<8x3072xf32, #tpu.memory_space<vmem>>, vector<8x512xf32>,
    %c768_i32 = arith.constant 768 : i32
    %88 = arith.addi %79, %c768_i32 : i32
    %89 = tpu.assume_multiple %88, 128 : i32
    %c0_55 = arith.constant 0 : index
    %90 = arith.index_cast %89 : i32 to index
    %91 = vector.load %arg8[%c0_55, %90] : memref<8x3072xf32, #tpu.memory_space<vmem>>, vector<8x512xf32>
    %92 = vector.extract_strided_slice %78 {offsets = [8, 0], sizes = [8, 512], strides = [1, 1]} : vector<40x512xf32> to vector<8x512xf32>
    %93 = arith.addf %91, %92 : vector<8x512xf32>
    %c0_56 = arith.constant 0 : index
    %94 = arith.index_cast %89 : i32 to index
    %95 = vector.load %arg8[%c0_56, %94] : memref<8x3072xf32, #tpu.memory_space<vmem>>, vector<8x512xf32>
    tpu.vector_store %arg8[%c0_56, %94], %93 {strides = array<i32>} : memref<8x3072xf32, #tpu.memory_space<vmem>>, vector<8x512xf32>,
    %c512_i32_57 = arith.constant 512 : i32
    %96 = arith.addi %79, %c512_i32_57 : i32
    %97 = tpu.assume_multiple %96, 128 : i32
    %c0_58 = arith.constant 0 : index
    %98 = arith.index_cast %97 : i32 to index
    %99 = vector.load %arg8[%c0_58, %98] : memref<8x3072xf32, #tpu.memory_space<vmem>>, vector<8x512xf32>
    %100 = vector.extract_strided_slice %78 {offsets = [16, 0], sizes = [8, 512], strides = [1, 1]} : vector<40x512xf32> to vector<8x512xf32>
    %101 = arith.addf %99, %100 : vector<8x512xf32>
    %c0_59 = arith.constant 0 : index
    %102 = arith.index_cast %97 : i32 to index
    %103 = vector.load %arg8[%c0_59, %102] : memref<8x3072xf32, #tpu.memory_space<vmem>>, vector<8x512xf32>
    tpu.vector_store %arg8[%c0_59, %102], %101 {strides = array<i32>} : memref<8x3072xf32, #tpu.memory_space<vmem>>, vector<8x512xf32>,
    %c256_i32 = arith.constant 256 : i32
    %104 = arith.addi %79, %c256_i32 : i32
    %105 = tpu.assume_multiple %104, 128 : i32
    %c0_60 = arith.constant 0 : index
    %106 = arith.index_cast %105 : i32 to index
    %107 = vector.load %arg8[%c0_60, %106] : memref<8x3072xf32, #tpu.memory_space<vmem>>, vector<8x512xf32>
    %108 = vector.extract_strided_slice %78 {offsets = [24, 0], sizes = [8, 512], strides = [1, 1]} : vector<40x512xf32> to vector<8x512xf32>
    %109 = arith.addf %107, %108 : vector<8x512xf32>
    %c0_61 = arith.constant 0 : index
    %110 = arith.index_cast %105 : i32 to index
    %111 = vector.load %arg8[%c0_61, %110] : memref<8x3072xf32, #tpu.memory_space<vmem>>, vector<8x512xf32>
    tpu.vector_store %arg8[%c0_61, %110], %109 {strides = array<i32>} : memref<8x3072xf32, #tpu.memory_space<vmem>>, vector<8x512xf32>,
    %c0_i32_62 = arith.constant 0 : i32
    %112 = arith.addi %79, %c0_i32_62 : i32
    %113 = tpu.assume_multiple %112, 128 : i32
    %c0_63 = arith.constant 0 : index
    %114 = arith.index_cast %113 : i32 to index
    %115 = vector.load %arg8[%c0_63, %114] : memref<8x3072xf32, #tpu.memory_space<vmem>>, vector<8x512xf32>
    %116 = vector.extract_strided_slice %78 {offsets = [32, 0], sizes = [8, 512], strides = [1, 1]} : vector<40x512xf32> to vector<8x512xf32>
    %117 = arith.addf %115, %116 : vector<8x512xf32>
    %c0_64 = arith.constant 0 : index
    %118 = arith.index_cast %113 : i32 to index
    %119 = vector.load %arg8[%c0_64, %118] : memref<8x3072xf32, #tpu.memory_space<vmem>>, vector<8x512xf32>
    tpu.vector_store %arg8[%c0_64, %118], %117 {strides = array<i32>} : memref<8x3072xf32, #tpu.memory_space<vmem>>, vector<8x512xf32>,
    %c512_i32_65 = arith.constant 512 : i32
    %120 = arith.addi %79, %c512_i32_65 : i32
    %121 = tpu.assume_multiple %120, 128 : i32
    %c0_66 = arith.constant 0 : index
    %122 = arith.index_cast %121 : i32 to index
    %123 = vector.load %arg8[%c0_66, %122] : memref<8x3072xf32, #tpu.memory_space<vmem>>, vector<8x512xf32>
    %124 = arith.extf %4 : vector<8x512xbf16> to vector<8x512xf32>
    %125 = arith.addf %123, %124 : vector<8x512xf32>
    %c0_67 = arith.constant 0 : index
    %126 = arith.index_cast %121 : i32 to index
    %127 = vector.load %arg8[%c0_67, %126] : memref<8x3072xf32, #tpu.memory_space<vmem>>, vector<8x512xf32>
    tpu.vector_store %arg8[%c0_67, %126], %125 {strides = array<i32>} : memref<8x3072xf32, #tpu.memory_space<vmem>>, vector<8x512xf32>,
    %c3_i32 = arith.constant 3 : i32
    %128 = arith.cmpi eq, %arg1, %c3_i32 : i32
    %129 = arith.extui %128 : i1 to i32
    %c0_i32_68 = arith.constant 0 : i32
    %130 = arith.cmpi ne, %129, %c0_i32_68 : i32
    scf.if %130 {
      %c0_69 = arith.constant 0 : index
      %c512 = arith.constant 512 : index
      %131 = vector.load %arg8[%c0_69, %c512] : memref<8x3072xf32, #tpu.memory_space<vmem>>, vector<8x512xf32>
      %cst_70 = arith.constant 0.000000e+00 : f32
      %132 = vector.broadcast %cst_70 : f32 to vector<8x512xf32>
      %133 = arith.cmpf ogt, %131, %132 : vector<8x512xf32>
      %cst_71 = arith.constant 0.00999999977 : f32
      %134 = vector.broadcast %cst_71 : f32 to vector<8x512xf32>
      %135 = arith.mulf %134, %131 : vector<8x512xf32>
      %136 = arith.select %133, %131, %135 : vector<8x512xi1>, vector<8x512xf32>
      %c0_72 = arith.constant 0 : index
      %c0_73 = arith.constant 0 : index
      %c0_74 = arith.constant 0 : index
      %137 = vector.load %arg7[%c0_72, %c0_73, %c0_74] : memref<1x8x2048xf32, #tpu.memory_space<vmem>>, vector<1x8x512xf32>
      %138 = vector.shape_cast %137 : vector<1x8x512xf32> to vector<8x512xf32>
      %139 = vector.shape_cast %136 : vector<8x512xf32> to vector<1x8x512xf32>
      tpu.vector_store %arg7[%c0_72, %c0_73, %c0_74], %139 {strides = array<i32>} : memref<1x8x2048xf32, #tpu.memory_space<vmem>>, vector<1x8x512xf32>,
      %c0_75 = arith.constant 0 : index
      %c1024 = arith.constant 1024 : index
      %140 = vector.load %arg8[%c0_75, %c1024] : memref<8x3072xf32, #tpu.memory_space<vmem>>, vector<8x512xf32>
      %cst_76 = arith.constant 0.000000e+00 : f32
      %141 = vector.broadcast %cst_76 : f32 to vector<8x512xf32>
      %142 = arith.cmpf ogt, %140, %141 : vector<8x512xf32>
      %cst_77 = arith.constant 0.00999999977 : f32
      %143 = vector.broadcast %cst_77 : f32 to vector<8x512xf32>
      %144 = arith.mulf %143, %140 : vector<8x512xf32>
      %145 = arith.select %142, %140, %144 : vector<8x512xi1>, vector<8x512xf32>
      %c0_78 = arith.constant 0 : index
      %c0_79 = arith.constant 0 : index
      %c512_80 = arith.constant 512 : index
      %146 = vector.load %arg7[%c0_78, %c0_79, %c512_80] : memref<1x8x2048xf32, #tpu.memory_space<vmem>>, vector<1x8x512xf32>
      %147 = vector.shape_cast %146 : vector<1x8x512xf32> to vector<8x512xf32>
      %148 = vector.shape_cast %145 : vector<8x512xf32> to vector<1x8x512xf32>
      tpu.vector_store %arg7[%c0_78, %c0_79, %c512_80], %148 {strides = array<i32>} : memref<1x8x2048xf32, #tpu.memory_space<vmem>>, vector<1x8x512xf32>,
      %c0_81 = arith.constant 0 : index
      %c1536 = arith.constant 1536 : index
      %149 = vector.load %arg8[%c0_81, %c1536] : memref<8x3072xf32, #tpu.memory_space<vmem>>, vector<8x512xf32>
      %cst_82 = arith.constant 0.000000e+00 : f32
      %150 = vector.broadcast %cst_82 : f32 to vector<8x512xf32>
      %151 = arith.cmpf ogt, %149, %150 : vector<8x512xf32>
      %cst_83 = arith.constant 0.00999999977 : f32
      %152 = vector.broadcast %cst_83 : f32 to vector<8x512xf32>
      %153 = arith.mulf %152, %149 : vector<8x512xf32>
      %154 = arith.select %151, %149, %153 : vector<8x512xi1>, vector<8x512xf32>
      %c0_84 = arith.constant 0 : index
      %c0_85 = arith.constant 0 : index
      %c1024_86 = arith.constant 1024 : index
      %155 = vector.load %arg7[%c0_84, %c0_85, %c1024_86] : memref<1x8x2048xf32, #tpu.memory_space<vmem>>, vector<1x8x512xf32>
      %156 = vector.shape_cast %155 : vector<1x8x512xf32> to vector<8x512xf32>
      %157 = vector.shape_cast %154 : vector<8x512xf32> to vector<1x8x512xf32>
      tpu.vector_store %arg7[%c0_84, %c0_85, %c1024_86], %157 {strides = array<i32>} : memref<1x8x2048xf32, #tpu.memory_space<vmem>>, vector<1x8x512xf32>,
      %c0_87 = arith.constant 0 : index
      %c2048 = arith.constant 2048 : index
      %158 = vector.load %arg8[%c0_87, %c2048] : memref<8x3072xf32, #tpu.memory_space<vmem>>, vector<8x512xf32>
      %cst_88 = arith.constant 0.000000e+00 : f32
      %159 = vector.broadcast %cst_88 : f32 to vector<8x512xf32>
      %160 = arith.cmpf ogt, %158, %159 : vector<8x512xf32>
      %cst_89 = arith.constant 0.00999999977 : f32
      %161 = vector.broadcast %cst_89 : f32 to vector<8x512xf32>
      %162 = arith.mulf %161, %158 : vector<8x512xf32>
      %163 = arith.select %160, %158, %162 : vector<8x512xi1>, vector<8x512xf32>
      %c0_90 = arith.constant 0 : index
      %c0_91 = arith.constant 0 : index
      %c1536_92 = arith.constant 1536 : index
      %164 = vector.load %arg7[%c0_90, %c0_91, %c1536_92] : memref<1x8x2048xf32, #tpu.memory_space<vmem>>, vector<1x8x512xf32>
      %165 = vector.shape_cast %164 : vector<1x8x512xf32> to vector<8x512xf32>
      %166 = vector.shape_cast %163 : vector<8x512xf32> to vector<1x8x512xf32>
      tpu.vector_store %arg7[%c0_90, %c0_91, %c1536_92], %166 {strides = array<i32>} : memref<1x8x2048xf32, #tpu.memory_space<vmem>>, vector<1x8x512xf32>,
    } else {
    }
    return
  }
  func.func @transform_0(%arg0: i32, %arg1: i32) -> (i32, i32, i32) {
    %c0_i32 = arith.constant 0 : i32
    %c0_i32_0 = arith.constant 0 : i32
    return %arg0, %c0_i32, %arg1 : i32, i32, i32
  }
  func.func @transform_1(%arg0: i32, %arg1: i32) -> (i32, i32) {
    %c0_i32 = arith.constant 0 : i32
    %c0_i32_0 = arith.constant 0 : i32
    %c0_i32_1 = arith.constant 0 : i32
    return %c0_i32, %c0_i32_0 : i32, i32
  }
  func.func @transform_2(%arg0: i32, %arg1: i32) -> (i32, i32) {
    %c0_i32 = arith.constant 0 : i32
    %c0_i32_0 = arith.constant 0 : i32
    %c0_i32_1 = arith.constant 0 : i32
    return %c0_i32, %c0_i32_0 : i32, i32
  }
  func.func @transform_3(%arg0: i32, %arg1: i32) -> (i32, i32, i32) {
    %c0_i32 = arith.constant 0 : i32
    %c0_i32_0 = arith.constant 0 : i32
    %c0_i32_1 = arith.constant 0 : i32
    %c0_i32_2 = arith.constant 0 : i32
    return %c0_i32, %c0_i32_0, %c0_i32_1 : i32, i32, i32
  }
  func.func @transform_4(%arg0: i32, %arg1: i32) -> (i32, i32) {
    %c0_i32 = arith.constant 0 : i32
    %c0_i32_0 = arith.constant 0 : i32
    %c0_i32_1 = arith.constant 0 : i32
    return %c0_i32, %c0_i32_0 : i32, i32
  }
  func.func @transform_5(%arg0: i32, %arg1: i32) -> (i32, i32, i32) {
    %c0_i32 = arith.constant 0 : i32
    %c0_i32_0 = arith.constant 0 : i32
    %c0_i32_1 = arith.constant 0 : i32
    return %arg0, %c0_i32, %c0_i32_0 : i32, i32, i32
  }
}

</mosaic_0001>

<bundles_post_ra>
// kernel: m3d2_forward.1
= control target key start
LH: loop header
LB: loop body
LE: loop exit
PB: predicated region body
PF: predicated region fallthrough
CT: control target
= control target key end

     0   :  { %s2855_s18 = smov 0   ;;  %s2857_s19 = smov 0   ;;  %s3321_s0 = inlined_call_operand.vmem [shape: bf16[2,8,2048], index: 0, kind: input, shape index: {}]   ;;  %s3322_s1 = inlined_call_operand.vmem [shape: f32[9,512], index: 1, kind: input, shape index: {}]   ;;  %s3323_s2 = inlined_call_operand.vmem [shape: bf16[4,8], index: 2, kind: input, shape index: {}]   ;;  %s3324_s3 = inlined_call_operand.vmem [shape: f32[9,4,4], index: 3, kind: input, shape index: {}]   ;;  %s3325_s4 = inlined_call_operand.vmem [shape: bf16[40,4], index: 4, kind: input, shape index: {}]   ;;  %s3326_s5 = inlined_call_operand.vmem [shape: f32[2,8,2048], index: 5, kind: output, shape index: {}]  }
   0x1   :  { %s2859_s20 = smov 0   ;;  %s2861_s21 = smov 0  }
   0x2   :  { %s2863_s22 = smov 0  }
   0x3 LB: > { %s24_s23 = sadd.s32 1, %s2804_s20  ;;  %s27_s24 = sadd.s32 1, %s2808_s21  ;;  %s2812_s22 = sphi %s2863_s22, %s15_s22   ;;  %s2808_s21 = sphi %s2861_s21, %s3330_s21   ;;  %s2804_s20 = sphi %s2859_s20, %s3329_s20   ;;  %s2800_s19 = sphi %s2857_s19, %s3328_s19   ;;  %s2796_s18 = sphi %s2855_s18, %s3327_s18  }
   0x4   : > { %p25_p0 = scmp.ge.s32.totalorder %s24_s23, 4  ;;  %p2611_p1 = scmp.ge.s32.totalorder %s2812_s22, 1 }
   0x5   : > { %p206_p2 = scmp.lt.s32.totalorder %s2812_s22, 9 }
   0x6   : > { %s3332_s23 = smov (%p25_p0, %s24_s23), 0  ;;  %s3334_s24 = smov (!%p25_p0, %s27_s24), %s2808_s21 }
   0x7   : > { %p207_p3 = pnand %p2611_p1, %p206_p2  ;;  %p29_p4 = scmp.ge.s32.totalorder %s3334_s24, 2 }
   0x8   : > { %s2612_s25 = sshll.u32 (!%p207_p3), %s2796_s18, 2  ;;  %p239_p5 = scmp.lt.s32.totalorder (!%p207_p3), %s2800_s19, 1 }
   0x9   : > { %s3336_s24 = smov (%p29_p4, %s3334_s24), 0  ;;  %210 = sbr.rel (%p207_p3) target bundleno = 895 (0x37f), region = 40 }
   0xa   : > { %p241_p6 = scmp.lt.s32.totalorder (!%p207_p3), %s2612_s25, 15  ;;  %p2617_p7 = scmp.ne.s32.totalorder (!%p207_p3), %s2796_s18, 0 }
   0xe   : > { %s3338_s19 = smov (!%p239_p5, %s2800_s19), 1  ;;  %s3340_s25 = smov (!%p241_p6, %s2612_s25), 15 }
   0xf   : > { %s2613_s26 = sshll.u32 %s3338_s19, 4  ;;  %s2715_s27 = sshll.u32 %s3338_s19, 7 }
  0x10   : > { %s244_s28 = sadd.s32 %s2613_s26, %s3340_s25  ;;  %s2891_s6 = scalar_lea.vmem %s3326_s5, %s2715_s27 }
  0x11   : > { %s2614_s7 = sshll.u32 %s244_s28, 2  ;;  %257 = sbr.rel (%p2617_p7) target bundleno = 35 (0x23), region = 44 }
  0x12   : > { %s2896_s10 = scalar_lea.vmem %s3321_s0, %s2614_s7 }
  0x16   : > { %v2814_v0 = vmov 0.0  }
  0x17   : > { %258 = vst [vmem:[#allocation2] sm:$0xff] %v2814_v0  ;;  %259 = vst [vmem:[#allocation2 + $0x8] sm:$0xff] %v2814_v0 }
  0x18   : > { %260 = vst [vmem:[#allocation2 + $0x10] sm:$0xff] %v2814_v0  ;;  %261 = vst [vmem:[#allocation2 + $0x18] sm:$0xff] %v2814_v0 }
  0x19   : > { %262 = vst [vmem:[#allocation2 + $0x20] sm:$0xff] %v2814_v0  ;;  %263 = vst [vmem:[#allocation2 + $0x28] sm:$0xff] %v2814_v0 }
  0x1a   : > { %264 = vst [vmem:[#allocation2 + $0x30] sm:$0xff] %v2814_v0  ;;  %265 = vst [vmem:[#allocation2 + $0x38] sm:$0xff] %v2814_v0 }
  0x1b   : > { %266 = vst [vmem:[#allocation2 + $0x40] sm:$0xff] %v2814_v0  ;;  %267 = vst [vmem:[#allocation2 + $0x48] sm:$0xff] %v2814_v0 }
  0x1c   : > { %268 = vst [vmem:[#allocation2 + $0x50] sm:$0xff] %v2814_v0  ;;  %269 = vst [vmem:[#allocation2 + $0x58] sm:$0xff] %v2814_v0 }
  0x1d   : > { %270 = vst [vmem:[#allocation2 + $0x60] sm:$0xff] %v2814_v0  ;;  %271 = vst [vmem:[#allocation2 + $0x68] sm:$0xff] %v2814_v0 }
  0x1e   : > { %272 = vst [vmem:[#allocation2 + $0x70] sm:$0xff] %v2814_v0  ;;  %273 = vst [vmem:[#allocation2 + $0x78] sm:$0xff] %v2814_v0 }
  0x1f   : > { %274 = vst [vmem:[#allocation2 + $0x80] sm:$0xff] %v2814_v0  ;;  %275 = vst [vmem:[#allocation2 + $0x88] sm:$0xff] %v2814_v0 }
  0x20   : > { %276 = vst [vmem:[#allocation2 + $0x90] sm:$0xff] %v2814_v0  ;;  %277 = vst [vmem:[#allocation2 + $0x98] sm:$0xff] %v2814_v0 }
  0x21   : > { %278 = vst [vmem:[#allocation2 + $0xa0] sm:$0xff] %v2814_v0  ;;  %279 = vst [vmem:[#allocation2 + $0xa8] sm:$0xff] %v2814_v0 }
  0x22   : > { %280 = vst [vmem:[#allocation2 + $0xb0] sm:$0xff] %v2814_v0  ;;  %281 = vst [vmem:[#allocation2 + $0xb8] sm:$0xff] %v2814_v0 }
  0x23 PF: > { %v2900_v1 = vld [vmem:[%s2896_s10] sm:$0xff]  ;;  %vm299_vm0 = vcmask 1043456   ;;  %v2903_v2 = vld [vmem:[%s2896_s10 + $0x8] sm:$0xff]  ;;  %v2815_v5 = vmov 0   ;;  %vm295_vm1 = vcmask 64512   ;;  %s2816_s13 = smov 16   ;;  %v402_v20 = vlaneseq }
  0x24   : > { %v2619_v3 = vcombine.high %v2900_v1, %v2900_v1  ;;  %v2621_v4 = vcombine.high %v2903_v2, %v2903_v2  ;;  %344 = vmatprep.mubr.bf16.mxu0 %v2815_v5  ;;  %385 = vmatprep.mubr.bf16.mxu1 %v2815_v5  ;;  %v2618_v6 = vcombine.low %v2900_v1, %v2900_v1  ;;  %v284_v10 = vld [vmem:[%s3323_s2] sm:$0x3]  ;;  %s2817_s14 = smov 17   ;;  %s2818_s15 = smov 15   ;;  %v2819_v19 = vmov 0.0  }
  0x25   : > { %v2620_v7 = vcombine.low %v2903_v2, %v2903_v2  ;;  %s2820_s16 = smov 1   ;;  %s2821_s17 = smov 127   ;;  %v412_v21 = vshrl.u32 %v402_v20, 7  ;;  %v2964_v22 = vand.u32 127, %v402_v20  ;;  %vm478_vm5 = vcmask 31744  }
  0x26   : > { %2622 = vmatprep.subr.msk.bf16.mxu0 %vm299_vm0, %v2619_v3  ;;  %2624 = vmatprep.subr.msk.bf16.mxu1 %vm299_vm0, %v2621_v4  ;;  %v301_v8 = vsel %vm299_vm0, %v2618_v6, 0  ;;  %s2822_s19 = smov 113   ;;  %s2823_s25 = smov 112   ;;  %v2626_v24 = vld [vmem:[%s3322_s1 + $0x1] ss:$8 sm:$0xf] }
  0x27   : > { %v307_v9 = vsel %vm299_vm0, %v2620_v7, 0  ;;  %327 = vmatpush1.bf16.msra.mxu0 %v301_v8  ;;  %s2824_s26 = smov 111   ;;  %v2966_v23 = vsub.s32 3, %v412_v21  ;;  %vm444_vm2 = vcmp.lt.s32.totalorder %v2964_v22, 16  ;;  %v2978_v40 = vsub.s32 0, %v412_v21  ;;  %s3257_s7 = sshll.u32 %s2796_s18, 9 }
  0x28   : > { %368 = vmatpush1.bf16.msra.mxu1 %v307_v9  ;;  %v2980_v41 = vsub.s32 1, %v412_v21  ;;  %v409_v42 = vld [vmem:[%s3322_s1] ss:$8 sm:$0xf]  ;;  %v2985_v43 = vsub.s32 2, %v412_v21  ;;  %vm404_vm3 = vcmp.lt.s32.totalorder %v2964_v22, 17 }
  0x29   : > { %v467_v27 = vrot.slane %v2626_v24, %v2966_v23  ;;  %v455_v46 = vrot.slane %v2626_v24, %v2978_v40  ;;  %v2995_v47 = vld [vmem:[%s3322_s1 + $0x2] ss:$8 sm:$0xf]  ;;  %v414_v52 = vrot.slane %v409_v42, %v2978_v40  ;;  %v426_v53 = vrot.slane %v409_v42, %v2966_v23  ;;  %v3018_v61 = vld [vmem:[%s3322_s1 + $0x3] ss:$8 sm:$0xf] }
  0x2a   : > { %2623 = vmatmul.mubr.msk.bf16.vlgmr.msra.gmra.mxu0 %vm295_vm1, %v284_v10  ;;  %v418_v48 = vrot.slane %v409_v42, %v2980_v41  ;;  %v459_v49 = vrot.slane %v2626_v24, %v2980_v41  ;;  %v463_v50 = vrot.slane %v2626_v24, %v2985_v43  ;;  %v422_v51 = vrot.slane %v409_v42, %v2985_v43  ;;  %v2627_v7 = vld [vmem:[%s3324_s3 + $0x4] sm:$0xf]  ;;  %s2341_s8 = sadd.s32 1024, %s3257_s7  ;;  %s2358_s12 = sadd.s32 768, %s3257_s7 }
  0x2b   : > { %2625 = vmatmul.mubr.msk.bf16.vlgmr.msra.gmra.mxu1 %vm295_vm1, %v284_v10  ;;  %558 = vmatprep.mubr.f32.mxu0 %v2819_v19  ;;  %vm801_vm4 = vcmp.lt.s32.totalorder %v2964_v22, 15  ;;  %v816_v55 = vrot.slane %v2995_v47, %v2980_v41  ;;  %v820_v56 = vrot.slane %v2995_v47, %v2985_v43  ;;  %v824_v57 = vrot.slane %v2995_v47, %v2966_v23  ;;  %s2342_s9 = sshra.s32 %s2341_s8, 7  ;;  %s2409_s30 = sshra.s32 %s3257_s7, 7 }
  0x2c   : > { %629 = vmatprep.mubr.f32.mxu1 %v2819_v19  ;;  %v812_v10 = vrot.slane %v2995_v47, %v2978_v40  ;;  %vm1004_vm6 = vcmp.lt.s32.totalorder %v2964_v22, 1  ;;  %v1015_v42 = vrot.slane %v3018_v61, %v2978_v40  ;;  %vm1370_vm7 = vcmp.lt.s32.totalorder %v2964_v22, 127  ;;  %s2707_s10 = sshll.u32 %s2342_s9, 3  ;;  %s2711_s8 = sshll.u32 %s2409_s30, 3 }
  0x2d   : > { %vm1573_vm8 = vcmp.lt.s32.totalorder %v2964_v22, 113  ;;  %vm1776_vm9 = vcmp.lt.s32.totalorder %v2964_v22, 112  ;;  %vm1979_vm10 = vcmp.lt.s32.totalorder %v2964_v22, 111  ;;  %v2688_v22 = vld [vmem:[%s3324_s3 + $0x20] sm:$0xf]  ;;  %vm2205_vm11 = vcmask 1041408  }
  0x2e   : > { %s2345_s11 = scalar_lea.vmem [#allocation2], %s2707_s10  ;;  %s2412_s9 = scalar_lea.vmem [#allocation2], %s2711_s8 }
  0x2f   : > { %p2712_p8 = scmp.ne.s32.totalorder %s2796_s18, 3 }
  0xea   : > { %v2922_v11 = vpop.f32.mrf.mxu0 }
  0xeb   : > { %v2924_v12 = vpop.f32.mrf.mxu1  ;;  %436 = vrot.lane.b32.xlu0 %v2922_v11, %s2816_s13 }
  0xec   : > { %440 = vrot.lane.b32.xlu1 %v2924_v12, %s2816_s13  ;;  %v2928_v13 = vpop.f32.mrf.mxu0 }
  0xed   : > { %v2930_v14 = vpop.f32.mrf.mxu1 }
  0xee   : > { %v350_v15 = vpop.f32.mrf.mxu0 }
  0xef   : > { %v391_v16 = vpop.f32.mrf.mxu1  ;;  %394 = vrot.lane.b32.xlu0 %v2922_v11, %s2817_s14 }
  0xf0   : > { %442 = vrot.lane.b32.xlu1 %v2930_v14, %s2816_s13  ;;  %v351_v17 = vpop.f32.mrf.mxu0 }
  0xf1   : > { %v392_v18 = vpop.f32.mrf.mxu1 }
  0xf2   : > { %v1019_v18 = vrot.slane %v3018_v61, %v2980_v41 }
  0xf3   : > { %398 = vrot.lane.b32.xlu0 %v2924_v12, %s2817_s14 }
  0xf4   : > { %396 = vrot.lane.b32.xlu1 %v2928_v13, %s2817_s14 }
  0xf7   : > { %793 = vrot.lane.b32.xlu0 %v2922_v11, %s2818_s15 }
  0xf8   : > { %400 = vrot.lane.b32.xlu1 %v2930_v14, %s2817_s14 }
  0xfb   : > { %797 = vrot.lane.b32.xlu0 %v2924_v12, %s2818_s15 }
  0xfc   : > { %795 = vrot.lane.b32.xlu1 %v2928_v13, %s2818_s15 }
  0xff   : > { %996 = vrot.lane.b32.xlu0 %v2922_v11, %s2820_s16 }
 0x100   : > { %799 = vrot.lane.b32.xlu1 %v2930_v14, %s2818_s15  ;;  %s2375_s15 = sadd.s32 512, %s3257_s7 }
 0x103   : > { %1000 = vrot.lane.b32.xlu0 %v2924_v12, %s2820_s16 }
 0x104   : > { %998 = vrot.lane.b32.xlu1 %v2928_v13, %s2820_s16 }
 0x107   : > { %438 = vrot.lane.b32.xlu0 %v2928_v13, %s2816_s13  ;;  %s2359_s13 = sshra.s32 %s2358_s12, 7 }
 0x108   : > { %1002 = vrot.lane.b32.xlu1 %v2930_v14, %s2820_s16  ;;  %s2708_s14 = sshll.u32 %s2359_s13, 3 }
 0x109   : > { %s2362_s16 = scalar_lea.vmem [#allocation2], %s2708_s14 }
 0x10b   : > { %1362 = vrot.lane.b32.xlu0 %v2922_v11, %s2821_s17 }
 0x10c   : > { %1364 = vrot.lane.b32.xlu1 %v2928_v13, %s2821_s17 }
 0x10f   : > { %1366 = vrot.lane.b32.xlu0 %v2924_v12, %s2821_s17 }
 0x110   : > { %1368 = vrot.lane.b32.xlu1 %v2930_v14, %s2821_s17  ;;  %s2376_s17 = sshra.s32 %s2375_s15, 7 }
 0x113   : > { %1565 = vrot.lane.b32.xlu0 %v2922_v11, %s2822_s19 }
 0x114   : > { %1567 = vrot.lane.b32.xlu1 %v2928_v13, %s2822_s19 }
 0x117   : > { %1569 = vrot.lane.b32.xlu0 %v2924_v12, %s2822_s19 }
 0x118   : > { %1571 = vrot.lane.b32.xlu1 %v2930_v14, %s2822_s19  ;;  %s2709_s19 = sshll.u32 %s2376_s17, 3 }
 0x11b   : > { %1768 = vrot.lane.b32.xlu0 %v2922_v11, %s2823_s25 }
 0x11c   : > { %1770 = vrot.lane.b32.xlu1 %v2928_v13, %s2823_s25 }
 0x11f   : > { %1772 = vrot.lane.b32.xlu0 %v2924_v12, %s2823_s25 }
 0x120   : > { %1774 = vrot.lane.b32.xlu1 %v2930_v14, %s2823_s25  ;;  %s2392_s25 = sadd.s32 256, %s3257_s7 }
 0x121   : > { %s2393_s27 = sshra.s32 %s2392_s25, 7 }
 0x122   : > { %s2710_s28 = sshll.u32 %s2393_s27, 3 }
 0x123   : > { %1971 = vrot.lane.b32.xlu0 %v2922_v11, %s2824_s26  ;;  %s2396_s29 = scalar_lea.vmem [#allocation2], %s2710_s28 }
 0x124   : > { %1973 = vrot.lane.b32.xlu1 %v2928_v13, %s2824_s26 }
 0x127   : > { %1975 = vrot.lane.b32.xlu0 %v2924_v12, %s2824_s26 }
 0x128   : > { %1977 = vrot.lane.b32.xlu1 %v2930_v14, %s2824_s26  ;;  %s3263_s26 = scalar_lea.vmem [#allocation2], %s2709_s19 }
 0x15d   : > { %v437_v26 = vpop.permute.xlu0 %436 }
 0x15e   : > { %v441_v25 = vpop.permute.xlu1 %440 }
 0x161   : > { %v395_v29 = vpop.permute.xlu0 %394 }
 0x162   : > { %v443_v28 = vpop.permute.xlu1 %442 }
 0x163   : > { %v445_v30 = vsel %vm444_vm2, %v441_v25, %v443_v28  ;;  %v448_v54 = vsel %vm444_vm2, %v443_v28, %v437_v26 }
 0x164   : > { %v475_v31 = vmul.f32 %v467_v27, %v445_v30  ;;  %v472_v8 = vmul.f32 %v455_v46, %v448_v54 }
 0x165   : > { %v399_v32 = vpop.permute.xlu0 %398 }
 0x166   : > { %2631 = vmatprep.subr.msk.mxu1 %vm299_vm0, %v475_v31  ;;  %v397_v33 = vpop.permute.xlu1 %396 }
 0x167   : > { %v406_v0 = vsel %vm404_vm3, %v397_v33, %v399_v32  ;;  %v407_v3 = vsel %vm404_vm3, %v395_v29, %v397_v33  ;;  %v435_v33 = vld [vmem:[%s3324_s3] sm:$0xf] }
 0x168   : > { %v432_v24 = vmul.f32 %v418_v48, %v407_v3 }
 0x169   : > { %v794_v34 = vpop.permute.xlu0 %793 }
 0x16a   : > { %v401_v35 = vpop.permute.xlu1 %400 }
 0x16b   : > { %v405_v60 = vsel %vm404_vm3, %v399_v32, %v401_v35  ;;  %v408_v9 = vsel %vm404_vm3, %v401_v35, %v395_v29 }
 0x16c   : > { %v434_v16 = vmul.f32 %v426_v53, %v405_v60  ;;  %v431_v27 = vmul.f32 %v414_v52, %v408_v9  ;;  %v2663_v53 = vld [vmem:[%s3322_s1 + $0x5] ss:$8 sm:$0xf] }
 0x16d   : > { %v798_v36 = vpop.permute.xlu0 %797  ;;  %v1393_v54 = vrot.slane %v2663_v53, %v2966_v23 }
 0x16e   : > { %v796_v37 = vpop.permute.xlu1 %795 }
 0x16f   : > { %v804_v17 = vsel %vm801_vm4, %v794_v34, %v796_v37  ;;  %v803_v28 = vsel %vm801_vm4, %v796_v37, %v798_v36 }
 0x170   : > { %v830_v30 = vmul.f32 %v816_v55, %v804_v17  ;;  %v831_v37 = vmul.f32 %v820_v56, %v803_v28  ;;  %v1385_v56 = vrot.slane %v2663_v53, %v2980_v41 }
 0x171   : > { %v2976_v38 = vpop.permute.xlu0 %996 }
 0x172   : > { %v800_v39 = vpop.permute.xlu1 %799 }
 0x173   : > { %v802_v15 = vsel %vm801_vm4, %v798_v36, %v800_v39  ;;  %v805_v31 = vsel %vm801_vm4, %v800_v39, %v794_v34  ;;  %v1023_v39 = vrot.slane %v3018_v61, %v2985_v43 }
 0x174   : > { %v832_v29 = vmul.f32 %v824_v57, %v802_v15  ;;  %v829_v46 = vmul.f32 %v812_v10, %v805_v31  ;;  %v2649_v57 = vld [vmem:[%s3324_s3 + $0xc] sm:$0xf] }
 0x175   : > { %v2987_v44 = vpop.permute.xlu0 %1000 }
 0x176   : > { %v2989_v45 = vpop.permute.xlu1 %998 }
 0x177   : > { %v1007_v35 = vsel %vm1004_vm6, %v2976_v38, %v2989_v45  ;;  %v1006_v47 = vsel %vm1004_vm6, %v2989_v45, %v2987_v44 }
 0x178   : > { %v1034_v52 = vmul.f32 %v1023_v39, %v1006_v47 }
 0x179   : > { %v439_v59 = vpop.permute.xlu0 %438 }
 0x17a   : > { %v1003_v58 = vpop.permute.xlu1 %1002  ;;  %v446_v62 = vsel %vm444_vm2, %v439_v59, %v441_v25  ;;  %v447_v63 = vsel %vm444_vm2, %v437_v26, %v439_v59  ;;  %v433_v25 = vmul.f32 %v422_v51, %v406_v0  ;;  %v1027_v26 = vrot.slane %v3018_v61, %v2966_v23  ;;  %v2641_v51 = vld [vmem:[%s3324_s3 + $0x8] sm:$0xf]  ;;  %v2671_v59 = vld [vmem:[%s3322_s1 + $0x6] ss:$8 sm:$0xf] }
 0x17b   : > { %v473_v4 = vmul.f32 %v459_v49, %v447_v63  ;;  %v474_v6 = vmul.f32 %v463_v50, %v446_v62  ;;  %v1005_v32 = vsel %vm1004_vm6, %v2987_v44, %v1003_v58  ;;  %v1033_v49 = vmul.f32 %v1019_v18, %v1007_v35 }
 0x17c   : > { %v1035_v48 = vmul.f32 %v1027_v26, %v1005_v32  ;;  %v1008_v50 = vsel %vm1004_vm6, %v1003_v58, %v2976_v38  ;;  %v1381_v62 = vrot.slane %v2663_v53, %v2978_v40  ;;  %v1389_v63 = vrot.slane %v2663_v53, %v2985_v43 }
 0x17d   : > { %2628 = vmatprep.subr.msk.mxu0 %vm299_vm0, %v473_v4  ;;  %2632 = vmatpush1.msk.msra.mxu1 %vm299_vm0, %v474_v6  ;;  %v3045_v21 = vpop.permute.xlu0 %1362  ;;  %v1032_v38 = vmul.f32 %v1015_v42, %v1008_v50  ;;  %v1596_v0 = vrot.slane %v2671_v59, %v2966_v23  ;;  %v1584_v9 = vrot.slane %v2671_v59, %v2978_v40  ;;  %v2687_v50 = vld [vmem:[%s3322_s1 + $0x20] ss:$8 sm:$0xf] }
 0x17e   : > { %v3041_v20 = vpop.permute.xlu1 %1364  ;;  %2629 = vmatpush1.msk.msra.mxu0 %vm299_vm0, %v472_v8  ;;  %2633 = vmatmul.mubr.msk.f32.vlgmr.msra.gmra.mxu1 %vm478_vm5, %v2627_v7  ;;  %v2656_v8 = vld [vmem:[%s3324_s3 + $0x10] sm:$0xf]  ;;  %v1592_v10 = vrot.slane %v2671_v59, %v2985_v43  ;;  %v1998_v53 = vrot.slane %v2687_v50, %v2985_v43 }
 0x17f   : > { %2637 = vmatprep.subr.msk.mxu1 %vm299_vm0, %v434_v16  ;;  %2630 = vmatmul.mubr.msk.f32.vlgmr.msra.gmra.mxu0 %vm478_vm5, %v2627_v7 }
 0x180   : > { %2634 = vmatprep.subr.msk.mxu0 %vm299_vm0, %v432_v24  ;;  %2638 = vmatpush1.msk.msra.mxu1 %vm299_vm0, %v433_v25 }
 0x181   : > { %2635 = vmatpush1.msk.msra.mxu0 %vm299_vm0, %v431_v27  ;;  %2645 = vmatprep.subr.msk.mxu1 %vm299_vm0, %v832_v29  ;;  %v1367_v36 = vpop.permute.xlu0 %1366  ;;  %v2664_v29 = vld [vmem:[%s3324_s3 + $0x14] sm:$0xf] }
 0x182   : > { %v1369_v34 = vpop.permute.xlu1 %1368  ;;  %786 = vmatprep.mubr.f32.mxu1 %v2819_v19  ;;  %2642 = vmatprep.subr.msk.mxu0 %vm299_vm0, %v830_v30  ;;  %v1372_v58 = vsel %vm1370_vm7, %v3041_v20, %v1367_v36 }
 0x183   : > { %715 = vmatprep.mubr.f32.mxu0 %v2819_v19  ;;  %2639 = vmatmul.mubr.msk.f32.vlgmr.msra.gmra.mxu1 %vm478_vm5, %v435_v33  ;;  %v1374_v55 = vsel %vm1370_vm7, %v1369_v34, %v3045_v21  ;;  %v1371_v4 = vsel %vm1370_vm7, %v1367_v36, %v1369_v34  ;;  %v1399_v6 = vmul.f32 %v1385_v56, %v1372_v58 }
 0x184   : > { %2646 = vmatpush1.msk.msra.mxu1 %vm299_vm0, %v831_v37  ;;  %2636 = vmatmul.mubr.msk.f32.vlgmr.msra.gmra.mxu0 %vm478_vm5, %v435_v33  ;;  %v1401_v3 = vmul.f32 %v1393_v54, %v1374_v55  ;;  %v1400_v18 = vmul.f32 %v1389_v63, %v1371_v4  ;;  %v2680_v54 = vld [vmem:[%s3324_s3 + $0x1c] sm:$0xf] }
 0x185   : > { %2643 = vmatpush1.msk.msra.mxu0 %vm299_vm0, %v829_v46  ;;  %2653 = vmatprep.subr.msk.mxu1 %vm299_vm0, %v1035_v48  ;;  %v1566_v45 = vpop.permute.xlu0 %1565  ;;  %v2672_v48 = vld [vmem:[%s3324_s3 + $0x18] sm:$0xf] }
 0x186   : > { %v1568_v44 = vpop.permute.xlu1 %1567  ;;  %2650 = vmatprep.subr.msk.mxu0 %vm299_vm0, %v1033_v49  ;;  %985 = vmatprep.mubr.f32.mxu1 %v2819_v19 }
 0x187   : > { %914 = vmatprep.mubr.f32.mxu0 %v2819_v19  ;;  %2647 = vmatmul.mubr.msk.f32.vlgmr.msra.gmra.mxu1 %vm478_vm5, %v2641_v51  ;;  %v1576_v26 = vsel %vm1573_vm8, %v1566_v45, %v1568_v44 }
 0x188   : > { %2654 = vmatpush1.msk.msra.mxu1 %vm299_vm0, %v1034_v52  ;;  %2644 = vmatmul.mubr.msk.f32.vlgmr.msra.gmra.mxu0 %vm478_vm5, %v2641_v51  ;;  %v1601_v37 = vmul.f32 %v1584_v9, %v1576_v26  ;;  %v1994_v52 = vrot.slane %v2687_v50, %v2980_v41 }
 0x189   : > { %2651 = vmatpush1.msk.msra.mxu0 %vm299_vm0, %v1032_v38  ;;  %2660 = vmatprep.subr.msk.mxu1 %vm299_vm0, %v2930_v14  ;;  %v1570_v61 = vpop.permute.xlu0 %1569  ;;  %v1588_v14 = vrot.slane %v2671_v59, %v2980_v41  ;;  %v1990_v38 = vrot.slane %v2687_v50, %v2978_v40 }
 0x18a   : > { %v1572_v60 = vpop.permute.xlu1 %1571  ;;  %2657 = vmatprep.subr.msk.mxu0 %vm299_vm0, %v2928_v13  ;;  %1188 = vmatprep.mubr.f32.mxu1 %v2819_v19  ;;  %v1373_v13 = vsel %vm1370_vm7, %v3045_v21, %v3041_v20  ;;  %v1575_v15 = vsel %vm1573_vm8, %v1568_v44, %v1570_v61  ;;  %v2002_v44 = vrot.slane %v2687_v50, %v2966_v23 }
 0x18b   : > { %1117 = vmatprep.mubr.f32.mxu0 %v2819_v19  ;;  %2655 = vmatmul.mubr.msk.f32.vlgmr.msra.gmra.mxu1 %vm478_vm5, %v2649_v57  ;;  %v1577_v7 = vsel %vm1573_vm8, %v1572_v60, %v1566_v45  ;;  %v1574_v20 = vsel %vm1573_vm8, %v1570_v61, %v1572_v60  ;;  %v1398_v24 = vmul.f32 %v1381_v62, %v1373_v13 }
 0x18c   : > { %2661 = vmatpush1.msk.msra.mxu1 %vm299_vm0, %v2924_v12  ;;  %2652 = vmatmul.mubr.msk.f32.vlgmr.msra.gmra.mxu0 %vm478_vm5, %v2649_v57  ;;  %v2679_v12 = vld [vmem:[%s3322_s1 + $0x7] ss:$8 sm:$0xf]  ;;  %v1602_v27 = vmul.f32 %v1588_v14, %v1575_v15  ;;  %v1603_v30 = vmul.f32 %v1592_v10, %v1574_v20 }
 0x18d   : > { %2658 = vmatpush1.msk.msra.mxu0 %vm299_vm0, %v2922_v11  ;;  %2668 = vmatprep.subr.msk.mxu1 %vm299_vm0, %v1401_v3  ;;  %v1769_v17 = vpop.permute.xlu0 %1768  ;;  %v1799_v21 = vrot.slane %v2679_v12, %v2966_v23  ;;  %v1604_v11 = vmul.f32 %v1596_v0, %v1577_v7  ;;  %v1791_v25 = vrot.slane %v2679_v12, %v2980_v41 }
 0x18e   : > { %v1771_v16 = vpop.permute.xlu1 %1770  ;;  %2665 = vmatprep.subr.msk.mxu0 %vm299_vm0, %v1399_v6  ;;  %1351 = vmatprep.mubr.f32.mxu1 %v2819_v19  ;;  %v1795_v28 = vrot.slane %v2679_v12, %v2985_v43  ;;  %v1787_v31 = vrot.slane %v2679_v12, %v2978_v40 }
 0x18f   : > { %1280 = vmatprep.mubr.f32.mxu0 %v2819_v19  ;;  %2662 = vmatmul.mubr.msk.f32.vlgmr.msra.gmra.mxu1 %vm478_vm5, %v2656_v8  ;;  %v1779_v46 = vsel %vm1776_vm9, %v1769_v17, %v1771_v16 }
 0x190   : > { %2669 = vmatpush1.msk.msra.mxu1 %vm299_vm0, %v1400_v18  ;;  %2659 = vmatmul.mubr.msk.f32.vlgmr.msra.gmra.mxu0 %vm478_vm5, %v2656_v8  ;;  %v1804_v45 = vmul.f32 %v1787_v31, %v1779_v46 }
 0x191   : > { %2666 = vmatpush1.msk.msra.mxu0 %vm299_vm0, %v1398_v24  ;;  %2676 = vmatprep.subr.msk.mxu1 %vm299_vm0, %v1604_v11  ;;  %v1773_v33 = vpop.permute.xlu0 %1772 }
 0x192   : > { %v1775_v32 = vpop.permute.xlu1 %1774  ;;  %2673 = vmatprep.subr.msk.mxu0 %vm299_vm0, %v1602_v27  ;;  %1554 = vmatprep.mubr.f32.mxu1 %v2819_v19  ;;  %v1778_v36 = vsel %vm1776_vm9, %v1771_v16, %v1773_v33 }
 0x193   : > { %v1780_v35 = vsel %vm1776_vm9, %v1775_v32, %v1769_v17  ;;  %v1777_v34 = vsel %vm1776_vm9, %v1773_v33, %v1775_v32  ;;  %v1805_v42 = vmul.f32 %v1791_v25, %v1778_v36  ;;  %1483 = vmatprep.mubr.f32.mxu0 %v2819_v19  ;;  %2670 = vmatmul.mubr.msk.f32.vlgmr.msra.gmra.mxu1 %vm478_vm5, %v2664_v29 }
 0x194   : > { %v1807_v39 = vmul.f32 %v1799_v21, %v1780_v35  ;;  %v1806_v47 = vmul.f32 %v1795_v28, %v1777_v34  ;;  %2677 = vmatpush1.msk.msra.mxu1 %vm299_vm0, %v1603_v30  ;;  %2667 = vmatmul.mubr.msk.f32.vlgmr.msra.gmra.mxu0 %vm478_vm5, %v2664_v29 }
 0x195   : > { %2674 = vmatpush1.msk.msra.mxu0 %vm299_vm0, %v1601_v37  ;;  %1757 = vmatprep.mubr.f32.mxu1 %v2819_v19  ;;  %v1972_v51 = vpop.permute.xlu0 %1971 }
 0x196   : > { %v1974_v49 = vpop.permute.xlu1 %1973  ;;  %2681 = vmatprep.subr.msk.mxu0 %vm299_vm0, %v1805_v42  ;;  %2684 = vmatprep.subr.msk.mxu1 %vm299_vm0, %v1807_v39 }
 0x197   : > { %1686 = vmatprep.mubr.f32.mxu0 %v2819_v19  ;;  %2678 = vmatmul.mubr.msk.f32.vlgmr.msra.gmra.mxu1 %vm478_vm5, %v2672_v48  ;;  %v1982_v23 = vsel %vm1979_vm10, %v1972_v51, %v1974_v49 }
 0x198   : > { %2685 = vmatpush1.msk.msra.mxu1 %vm299_vm0, %v1806_v47  ;;  %2675 = vmatmul.mubr.msk.f32.vlgmr.msra.gmra.mxu0 %vm478_vm5, %v2672_v48  ;;  %v2007_v60 = vmul.f32 %v1990_v38, %v1982_v23 }
 0x199   : > { %2682 = vmatpush1.msk.msra.mxu0 %vm299_vm0, %v1804_v45  ;;  %1960 = vmatprep.mubr.f32.mxu1 %v2819_v19  ;;  %v1976_v41 = vpop.permute.xlu0 %1975 }
 0x19a   : > { %v1978_v55 = vpop.permute.xlu1 %1977  ;;  %v1981_v56 = vsel %vm1979_vm10, %v1974_v49, %v1976_v41  ;;  %1889 = vmatprep.mubr.f32.mxu0 %v2819_v19 }
 0x19b   : > { %v1983_v40 = vsel %vm1979_vm10, %v1978_v55, %v1972_v51  ;;  %v1980_v43 = vsel %vm1979_vm10, %v1976_v41, %v1978_v55  ;;  %v2008_v58 = vmul.f32 %v1994_v52, %v1981_v56  ;;  %2686 = vmatmul.mubr.msk.f32.vlgmr.msra.gmra.mxu1 %vm478_vm5, %v2680_v54 }
 0x19c   : > { %v2010_v57 = vmul.f32 %v2002_v44, %v1983_v40  ;;  %v2009_v59 = vmul.f32 %v1998_v53, %v1980_v43  ;;  %2683 = vmatmul.mubr.msk.f32.vlgmr.msra.gmra.mxu0 %vm478_vm5, %v2680_v54  ;;  %2163 = vmatprep.mubr.f32.mxu1 %v2819_v19 }
 0x19d   : > { %2689 = vmatprep.subr.msk.mxu0 %vm299_vm0, %v2008_v58  ;;  %2092 = vmatprep.mubr.f32.mxu0 %v2819_v19 }
 0x19e   : > { %2692 = vmatprep.subr.msk.mxu1 %vm299_vm0, %v2010_v57  ;;  %2690 = vmatpush1.msk.msra.mxu0 %vm299_vm0, %v2007_v60 }
 0x19f   : > { %2693 = vmatpush1.msk.msra.mxu1 %vm299_vm0, %v2009_v59 }
 0x1a0   : > { %2691 = vmatmul.mubr.msk.f32.vlgmr.msra.gmra.mxu0 %vm478_vm5, %v2688_v22  ;;  %2694 = vmatmul.mubr.msk.f32.vlgmr.msra.gmra.mxu1 %vm478_vm5, %v2688_v22 }
 0x1a1   : > { %2250 = vmatprep.mubr.bf16.mxu0 %v2815_v5  ;;  %2311 = vmatprep.mubr.bf16.mxu1 %v2815_v5 }
 0x23e   : > { %v631_v61 = vpop.f32.mrf.mxu1 }
 0x23f   : > { %v560_v62 = vpop.f32.mrf.mxu0 }
 0x240   : > { %v633_v63 = vpop.f32.mrf.mxu1 }
 0x241   : > { %v562_v0 = vpop.f32.mrf.mxu0 }
 0x243   : > { %v788_v3 = vpop.f32.mrf.mxu1 }
 0x244   : > { %v717_v4 = vpop.f32.mrf.mxu0  ;;  %v789_v21 = vadd.f32 %v788_v3, %v631_v61 }
 0x245   : > { %v790_v14 = vpop.f32.mrf.mxu1  ;;  %v718_v24 = vadd.f32 %v717_v4, %v560_v62 }
 0x246   : > { %v719_v13 = vpop.f32.mrf.mxu0  ;;  %v791_v26 = vadd.f32 %v790_v14, %v633_v63 }
 0x247   : > { %v987_v6 = vpop.f32.mrf.mxu1  ;;  %v720_v27 = vadd.f32 %v719_v13, %v562_v0 }
 0x248   : > { %v916_v19 = vpop.f32.mrf.mxu0  ;;  %v994_v28 = vadd.f32 %v987_v6, %v789_v21  ;;  %v2349_v21 = vld [vmem:[%s2345_s11 + $0x18] sm:$0xff] }
 0x249   : > { %v989_v7 = vpop.f32.mrf.mxu1  ;;  %v992_v29 = vadd.f32 %v916_v19, %v718_v24 }
 0x24a   : > { %v918_v8 = vpop.f32.mrf.mxu0  ;;  %v995_v32 = vadd.f32 %v989_v7, %v791_v26 }
 0x24b   : > { %v1190_v9 = vpop.f32.mrf.mxu1  ;;  %v993_v33 = vadd.f32 %v918_v8, %v720_v27 }
 0x24c   : > { %v1119_v10 = vpop.f32.mrf.mxu0  ;;  %v1197_v35 = vadd.f32 %v1190_v9, %v994_v28 }
 0x24d   : > { %v1192_v15 = vpop.f32.mrf.mxu1  ;;  %v1195_v34 = vadd.f32 %v1119_v10, %v992_v29  ;;  %v2771_v10 = vld [vmem:[%s3325_s4] sm:$0xff]  }
 0x24e   : > { %v1121_v16 = vpop.f32.mrf.mxu0  ;;  %v1198_v39 = vadd.f32 %v1192_v15, %v995_v32  ;;  %v2772_v15 = vld [vmem:[%s3325_s4 + $0x8] sm:$0xff]  }
 0x24f   : > { %v1353_v12 = vpop.f32.mrf.mxu1  ;;  %v1196_v42 = vadd.f32 %v1121_v16, %v993_v33  ;;  %v2773_v16 = vld [vmem:[%s3325_s4 + $0x10] ss:$0 sps:$4 sm:$0xff]  }
 0x250   : > { %v1282_v17 = vpop.f32.mrf.mxu0  ;;  %v1360_v46 = vadd.f32 %v1353_v12, %v1197_v35  ;;  %v2346_v12 = vld [vmem:[%s2345_s11] sm:$0xff] }
 0x251   : > { %v1355_v18 = vpop.f32.mrf.mxu1  ;;  %v1358_v47 = vadd.f32 %v1282_v17, %v1195_v34  ;;  %v2348_v17 = vld [vmem:[%s2345_s11 + $0x10] sm:$0xff] }
 0x252   : > { %v1284_v20 = vpop.f32.mrf.mxu0  ;;  %v1361_v50 = vadd.f32 %v1355_v18, %v1198_v39 }
 0x253   : > { %v1556_v11 = vpop.f32.mrf.mxu1  ;;  %v1359_v51 = vadd.f32 %v1284_v20, %v1196_v42  ;;  %v2347_v20 = vld [vmem:[%s2345_s11 + $0x8] sm:$0xff] }
 0x254   : > { %v1485_v25 = vpop.f32.mrf.mxu0  ;;  %v1563_v44 = vadd.f32 %v1556_v11, %v1360_v46 }
 0x255   : > { %v1558_v30 = vpop.f32.mrf.mxu1  ;;  %v1561_v45 = vadd.f32 %v1485_v25, %v1358_v47 }
 0x256   : > { %v1487_v31 = vpop.f32.mrf.mxu0  ;;  %v1564_v38 = vadd.f32 %v1558_v30, %v1361_v50 }
 0x257   : > { %v1759_v36 = vpop.f32.mrf.mxu1  ;;  %v1562_v54 = vadd.f32 %v1487_v31, %v1359_v51 }
 0x258   : > { %v1688_v37 = vpop.f32.mrf.mxu0  ;;  %v1766_v23 = vadd.f32 %v1759_v36, %v1563_v44 }
 0x259   : > { %v1761_v48 = vpop.f32.mrf.mxu1  ;;  %v1764_v55 = vadd.f32 %v1688_v37, %v1561_v45 }
 0x25a   : > { %v1690_v49 = vpop.f32.mrf.mxu0  ;;  %v1767_v43 = vadd.f32 %v1761_v48, %v1564_v38 }
 0x25b   : > { %v1962_v52 = vpop.f32.mrf.mxu1  ;;  %v1765_v56 = vadd.f32 %v1690_v49, %v1562_v54 }
 0x25c   : > { %v1891_v53 = vpop.f32.mrf.mxu0  ;;  %v1969_v57 = vadd.f32 %v1962_v52, %v1766_v23 }
 0x25d   : > { %v1964_v41 = vpop.f32.mrf.mxu1  ;;  %v1967_v58 = vadd.f32 %v1891_v53, %v1764_v55 }
 0x25e   : > { %v1893_v40 = vpop.f32.mrf.mxu0  ;;  %v1970_v22 = vadd.f32 %v1964_v41, %v1767_v43 }
 0x25f   : > { %v1968_v61 = vadd.f32 %v1893_v40, %v1765_v56 }
 0x260   : > { %v2094_v59 = vpop.f32.mrf.mxu0  ;;  %v2165_v60 = vpop.f32.mrf.mxu1 }
 0x261   : > { %v2170_v62 = vadd.f32 %v2094_v59, %v1967_v58  ;;  %v2172_v63 = vadd.f32 %v2165_v60, %v1969_v57 }
 0x262   : > { %v2096_v0 = vpop.f32.mrf.mxu0  ;;  %v2167_v3 = vpop.f32.mrf.mxu1 }
 0x263   : > { %v2179_v4 = vpack.c.bf16 %v2170_v62, %v2170_v62  ;;  %v2181_v14 = vpack.c.bf16 %v2172_v63, %v2172_v63  ;;  %v2171_v13 = vadd.f32 %v2096_v0, %v1968_v61  ;;  %v2173_v6 = vadd.f32 %v2167_v3, %v1970_v22 }
 0x265   : > { %v2180_v19 = vpack.c.bf16 %v2171_v13, %v2171_v13  ;;  %v2182_v7 = vpack.c.bf16 %v2173_v6, %v2173_v6  ;;  %v2207_v8 = vsel %vm2205_vm11, %v2179_v4, 0  ;;  %v2213_v9 = vsel %vm2205_vm11, %v2181_v14, 0 }
 0x267   : > { %2698 = vmatprep.subr.msk.bf16.mxu0 %vm2205_vm11, %v2180_v19  ;;  %2702 = vmatprep.subr.msk.bf16.mxu1 %vm2205_vm11, %v2182_v7 }
 0x268   : > { %2233 = vmatpush1.bf16.msra.mxu0 %v2207_v8  ;;  %2294 = vmatpush1.bf16.msra.mxu1 %v2213_v9 }
 0x26b   : > { %2699 = vmatmul.mubr.msk.bf16.vlgmr.msra.gmra.mxu0 %vm478_vm5, %v2771_v10  ;;  %2703 = vmatmul.mubr.msk.bf16.vlgmr.msra.gmra.mxu1 %vm478_vm5, %v2771_v10 }
 0x26c   : > { %2260 = vmatprep.mubr.bf16.mxu0 %v2815_v5  ;;  %2321 = vmatprep.mubr.bf16.mxu1 %v2815_v5 }
 0x273   : > { %2700 = vmatmul.mubr.msk.bf16.gmra.mxu0 %vm478_vm5, %v2772_v15  ;;  %2704 = vmatmul.mubr.msk.bf16.gmra.mxu1 %vm478_vm5, %v2772_v15 }
 0x274   : > { %2270 = vmatprep.mubr.bf16.mxu0 %v2815_v5  ;;  %2331 = vmatprep.mubr.bf16.mxu1 %v2815_v5 }
 0x27b   : > { %2701 = vmatmul.mubr.msk.bf16.gmra.mxu0 %vm478_vm5, %v2773_v16  ;;  %2705 = vmatmul.mubr.msk.bf16.gmra.mxu1 %vm478_vm5, %v2773_v16 }
 0x32b   : > { %v2252_v18 = vpop.f32.mrf.mxu0  ;;  %v2313_v5 = vpop.f32.mrf.mxu1 }
 0x32c   : > { %v2350_v24 = vadd.f32 %v2346_v12, %v2252_v18  ;;  %v2352_v11 = vadd.f32 %v2348_v17, %v2313_v5  ;;  %v2429_v18 = vunpack.c.l.bf16 %v2900_v1  ;;  %v2430_v5 = vunpack.c.h.bf16 %v2900_v1 }
 0x32d   : > { %v2254_v25 = vpop.f32.mrf.mxu0  ;;  %v2315_v26 = vpop.f32.mrf.mxu1 }
 0x32e   : > { %2354 = vst [vmem:[%s2345_s11] sm:$0xff] %v2350_v24  ;;  %2356 = vst [vmem:[%s2345_s11 + $0x10] sm:$0xff] %v2352_v11  ;;  %v2351_v27 = vadd.f32 %v2347_v20, %v2254_v25  ;;  %v2353_v28 = vadd.f32 %v2349_v21, %v2315_v26  ;;  %v2431_v20 = vunpack.c.l.bf16 %v2903_v2  ;;  %v2432_v21 = vunpack.c.h.bf16 %v2903_v2 }
 0x32f   : > { %v2256_v29 = vpop.f32.mrf.mxu0  ;;  %v2317_v30 = vpop.f32.mrf.mxu1 }
 0x330   : > { %2355 = vst [vmem:[%s2345_s11 + $0x8] sm:$0xff] %v2351_v27  ;;  %2357 = vst [vmem:[%s2345_s11 + $0x18] sm:$0xff] %v2353_v28 }
 0x331   : > { %v2258_v31 = vpop.f32.mrf.mxu0  ;;  %v2319_v32 = vpop.f32.mrf.mxu1 }
 0x333   : > { %v2262_v33 = vpop.f32.mrf.mxu0  ;;  %v2323_v35 = vpop.f32.mrf.mxu1 }
 0x335   : > { %v2264_v34 = vpop.f32.mrf.mxu0  ;;  %v2325_v36 = vpop.f32.mrf.mxu1 }
 0x337   : > { %v2363_v37 = vld [vmem:[%s2362_s16] sm:$0xff]  ;;  %v2365_v39 = vld [vmem:[%s2362_s16 + $0x10] sm:$0xff]  ;;  %v2364_v42 = vld [vmem:[%s2362_s16 + $0x8] sm:$0xff]  ;;  %v2266_v46 = vpop.f32.mrf.mxu0  ;;  %v2327_v47 = vpop.f32.mrf.mxu1 }
 0x338   : > { %v2367_v48 = vadd.f32 %v2363_v37, %v2256_v29  ;;  %v2369_v49 = vadd.f32 %v2365_v39, %v2317_v30  ;;  %v2368_v50 = vadd.f32 %v2364_v42, %v2258_v31  ;;  %v2366_v51 = vld [vmem:[%s2362_s16 + $0x18] sm:$0xff] }
 0x339   : > { %v2370_v44 = vadd.f32 %v2366_v51, %v2319_v32  ;;  %v2268_v45 = vpop.f32.mrf.mxu0  ;;  %v2329_v52 = vpop.f32.mrf.mxu1 }
 0x33a   : > { %2371 = vst [vmem:[%s2362_s16] sm:$0xff] %v2367_v48  ;;  %2373 = vst [vmem:[%s2362_s16 + $0x10] sm:$0xff] %v2369_v49 }
 0x33b   : > { %2372 = vst [vmem:[%s2362_s16 + $0x8] sm:$0xff] %v2368_v50  ;;  %2374 = vst [vmem:[%s2362_s16 + $0x18] sm:$0xff] %v2370_v44  ;;  %v2272_v53 = vpop.f32.mrf.mxu0  ;;  %v2333_v38 = vpop.f32.mrf.mxu1 }
 0x33d   : > { %v2274_v54 = vpop.f32.mrf.mxu0  ;;  %v2335_v23 = vpop.f32.mrf.mxu1 }
 0x33f   : > { %v2276_v55 = vpop.f32.mrf.mxu0  ;;  %v2337_v41 = vpop.f32.mrf.mxu1 }
 0x341   : > { %v2277_v40 = vpop.f32.mrf.mxu0  ;;  %v2338_v43 = vpop.f32.mrf.mxu1 }
 0x342   : > { %v2380_v56 = vld [vmem:[%s3263_s26] sm:$0xff]  ;;  %v2382_v57 = vld [vmem:[%s3263_s26 + $0x10] sm:$0xff]  ;;  %v2381_v58 = vld [vmem:[%s3263_s26 + $0x8] sm:$0xff] }
 0x343   : > { %v2384_v59 = vadd.f32 %v2380_v56, %v2262_v33  ;;  %v2386_v60 = vadd.f32 %v2382_v57, %v2323_v35  ;;  %v2385_v22 = vadd.f32 %v2381_v58, %v2264_v34  ;;  %v2383_v61 = vld [vmem:[%s3263_s26 + $0x18] sm:$0xff] }
 0x344   : > { %v2387_v62 = vadd.f32 %v2383_v61, %v2325_v36 }
 0x345   : > { %2388 = vst [vmem:[%s3263_s26] sm:$0xff] %v2384_v59  ;;  %2390 = vst [vmem:[%s3263_s26 + $0x10] sm:$0xff] %v2386_v60 }
 0x346   : > { %2389 = vst [vmem:[%s3263_s26 + $0x8] sm:$0xff] %v2385_v22  ;;  %2391 = vst [vmem:[%s3263_s26 + $0x18] sm:$0xff] %v2387_v62 }
 0x34d   : > { %v2397_v63 = vld [vmem:[%s2396_s29] sm:$0xff]  ;;  %v2399_v0 = vld [vmem:[%s2396_s29 + $0x10] sm:$0xff]  ;;  %v2398_v3 = vld [vmem:[%s2396_s29 + $0x8] sm:$0xff] }
 0x34e   : > { %v2401_v4 = vadd.f32 %v2397_v63, %v2266_v46  ;;  %v2403_v14 = vadd.f32 %v2399_v0, %v2327_v47  ;;  %v2402_v13 = vadd.f32 %v2398_v3, %v2268_v45  ;;  %v2400_v6 = vld [vmem:[%s2396_s29 + $0x18] sm:$0xff] }
 0x34f   : > { %v2404_v19 = vadd.f32 %v2400_v6, %v2329_v52 }
 0x350   : > { %2405 = vst [vmem:[%s2396_s29] sm:$0xff] %v2401_v4  ;;  %2407 = vst [vmem:[%s2396_s29 + $0x10] sm:$0xff] %v2403_v14 }
 0x351   : > { %2406 = vst [vmem:[%s2396_s29 + $0x8] sm:$0xff] %v2402_v13  ;;  %2408 = vst [vmem:[%s2396_s29 + $0x18] sm:$0xff] %v2404_v19 }
 0x358   : > { %v2413_v7 = vld [vmem:[%s2412_s9] sm:$0xff]  ;;  %v2415_v8 = vld [vmem:[%s2412_s9 + $0x10] sm:$0xff]  ;;  %v2414_v9 = vld [vmem:[%s2412_s9 + $0x8] sm:$0xff] }
 0x359   : > { %v2417_v10 = vadd.f32 %v2413_v7, %v2272_v53  ;;  %v2419_v15 = vadd.f32 %v2415_v8, %v2333_v38  ;;  %v2418_v16 = vadd.f32 %v2414_v9, %v2274_v54  ;;  %v2416_v12 = vld [vmem:[%s2412_s9 + $0x18] sm:$0xff] }
 0x35a   : > { %v2420_v17 = vadd.f32 %v2416_v12, %v2335_v23 }
 0x35b   : > { %2421 = vst [vmem:[%s2412_s9] sm:$0xff] %v2417_v10  ;;  %2423 = vst [vmem:[%s2412_s9 + $0x10] sm:$0xff] %v2419_v15 }
 0x35c   : > { %2422 = vst [vmem:[%s2412_s9 + $0x8] sm:$0xff] %v2418_v16  ;;  %2424 = vst [vmem:[%s2412_s9 + $0x18] sm:$0xff] %v2420_v17 }
 0x363   : > { %v2425_v24 = vld [vmem:[%s3263_s26] sm:$0xff]  ;;  %v2426_v11 = vld [vmem:[%s3263_s26 + $0x8] sm:$0xff]  ;;  %v2427_v25 = vld [vmem:[%s3263_s26 + $0x10] sm:$0xff]  ;;  %2444 = sbr.rel (%p2712_p8) target bundleno = 895 (0x37f), region = 48 }
 0x364   : > { %v2428_v26 = vld [vmem:[%s3263_s26 + $0x18] sm:$0xff]  ;;  %v2433_v27 = vadd.f32 %v2429_v18, %v2425_v24  ;;  %v2434_v28 = vadd.f32 %v2430_v5, %v2426_v11  ;;  %v2435_v29 = vadd.f32 %v2431_v20, %v2427_v25 }
 0x365   : > { %v2436_v30 = vadd.f32 %v2432_v21, %v2428_v26 }
 0x366   : > { %2437 = vst [vmem:[%s3263_s26] sm:$0xff] %v2433_v27  ;;  %2438 = vst [vmem:[%s3263_s26 + $0x8] sm:$0xff] %v2434_v28 }
 0x367   : > { %2439 = vst [vmem:[%s3263_s26 + $0x10] sm:$0xff] %v2435_v29  ;;  %2440 = vst [vmem:[%s3263_s26 + $0x18] sm:$0xff] %v2436_v30 }
 0x36e   : > { %v2445_v1 = vld [vmem:[#allocation2 + $0x20] sm:$0xff]  ;;  %v2446_v31 = vld [vmem:[#allocation2 + $0x28] sm:$0xff]  ;;  %v2447_v32 = vld [vmem:[#allocation2 + $0x30] sm:$0xff] }
 0x36f   : > { %vm2449_vm12 = vcmp.gt.f32.partialorder %v2445_v1, 0.0  ;;  %v2453_v2 = vmul.f32 0.01, %v2445_v1  ;;  %vm2450_vm13 = vcmp.gt.f32.partialorder %v2446_v31, 0.0  ;;  %v2454_v33 = vmul.f32 0.01, %v2446_v31 }
 0x370   : > { %vm2451_vm14 = vcmp.gt.f32.partialorder %v2447_v32, 0.0  ;;  %v2455_v35 = vmul.f32 0.01, %v2447_v32  ;;  %v2448_v34 = vld [vmem:[#allocation2 + $0x38] sm:$0xff]  ;;  %v2465_v36 = vld [vmem:[#allocation2 + $0x40] sm:$0xff]  ;;  %v2466_v37 = vld [vmem:[#allocation2 + $0x48] sm:$0xff] }
 0x371   : > { %v2457_v39 = vsel %vm2449_vm12, %v2445_v1, %v2453_v2  ;;  %v2458_v42 = vsel %vm2450_vm13, %v2446_v31, %v2454_v33  ;;  %vm2452_vm15 = vcmp.gt.f32.partialorder %v2448_v34, 0.0  ;;  %v2456_v46 = vmul.f32 0.01, %v2448_v34  ;;  %v2467_v47 = vld [vmem:[#allocation2 + $0x50] sm:$0xff]  ;;  %v2468_v48 = vld [vmem:[#allocation2 + $0x58] sm:$0xff]  ;;  %v2485_v49 = vld [vmem:[#allocation2 + $0x60] sm:$0xff] }
 0x372   : > { %2461 = vst [vmem:[%s2891_s6] sm:$0xff] %v2457_v39  ;;  %2462 = vst [vmem:[%s2891_s6 + $0x8] sm:$0xff] %v2458_v42  ;;  %v2459_v50 = vsel %vm2451_vm14, %v2447_v32, %v2455_v35  ;;  %vm2469_vm0 = vcmp.gt.f32.partialorder %v2465_v36, 0.0  ;;  %v2473_v51 = vmul.f32 0.01, %v2465_v36  ;;  %vm2470_vm1 = vcmp.gt.f32.partialorder %v2466_v37, 0.0  ;;  %v2486_v44 = vld [vmem:[#allocation2 + $0x68] sm:$0xff] }
 0x373   : > { %2463 = vst [vmem:[%s2891_s6 + $0x10] sm:$0xff] %v2459_v50  ;;  %v2460_v45 = vsel %vm2452_vm15, %v2448_v34, %v2456_v46  ;;  %v2474_v52 = vmul.f32 0.01, %v2466_v37  ;;  %vm2471_vm2 = vcmp.gt.f32.partialorder %v2467_v47, 0.0  ;;  %v2475_v53 = vmul.f32 0.01, %v2467_v47 }
 0x374   : > { %v2487_v38 = vld [vmem:[#allocation2 + $0x70] sm:$0xff]  ;;  %2464 = vst [vmem:[%s2891_s6 + $0x18] sm:$0xff] %v2460_v45  ;;  %v2477_v54 = vsel %vm2469_vm0, %v2465_v36, %v2473_v51  ;;  %vm2472_vm3 = vcmp.gt.f32.partialorder %v2468_v48, 0.0  ;;  %v2476_v23 = vmul.f32 0.01, %v2468_v48  ;;  %vm2489_vm4 = vcmp.gt.f32.partialorder %v2485_v49, 0.0 }
 0x375   : > { %v2488_v55 = vld [vmem:[#allocation2 + $0x78] sm:$0xff]  ;;  %v2505_v41 = vld [vmem:[#allocation2 + $0x80] sm:$0xff]  ;;  %2481 = vst [vmem:[%s2891_s6 + $0x20] sm:$0xff] %v2477_v54  ;;  %v2478_v40 = vsel %vm2470_vm1, %v2466_v37, %v2474_v52  ;;  %v2479_v43 = vsel %vm2471_vm2, %v2467_v47, %v2475_v53  ;;  %v2493_v56 = vmul.f32 0.01, %v2485_v49  ;;  %vm2490_vm5 = vcmp.gt.f32.partialorder %v2486_v44, 0.0 }
 0x376   : > { %v2506_v57 = vld [vmem:[#allocation2 + $0x88] sm:$0xff]  ;;  %2482 = vst [vmem:[%s2891_s6 + $0x28] sm:$0xff] %v2478_v40  ;;  %2483 = vst [vmem:[%s2891_s6 + $0x30] sm:$0xff] %v2479_v43  ;;  %v2480_v58 = vsel %vm2472_vm3, %v2468_v48, %v2476_v23  ;;  %v2494_v59 = vmul.f32 0.01, %v2486_v44  ;;  %vm2491_vm6 = vcmp.gt.f32.partialorder %v2487_v38, 0.0 }
 0x377   : > { %v2495_v60 = vmul.f32 0.01, %v2487_v38  ;;  %v2507_v22 = vld [vmem:[#allocation2 + $0x90] sm:$0xff]  ;;  %2484 = vst [vmem:[%s2891_s6 + $0x38] sm:$0xff] %v2480_v58  ;;  %v2497_v61 = vsel %vm2489_vm4, %v2485_v49, %v2493_v56  ;;  %vm2492_vm7 = vcmp.gt.f32.partialorder %v2488_v55, 0.0  ;;  %vm2509_vm8 = vcmp.gt.f32.partialorder %v2505_v41, 0.0 }
 0x378   : > { %v2496_v62 = vmul.f32 0.01, %v2488_v55  ;;  %v2508_v63 = vld [vmem:[#allocation2 + $0x98] sm:$0xff]  ;;  %2501 = vst [vmem:[%s2891_s6 + $0x40] sm:$0xff] %v2497_v61  ;;  %v2498_v0 = vsel %vm2490_vm5, %v2486_v44, %v2494_v59  ;;  %v2513_v4 = vmul.f32 0.01, %v2505_v41 }
 0x379   : > { %v2499_v3 = vsel %vm2491_vm6, %v2487_v38, %v2495_v60  ;;  %vm2510_vm9 = vcmp.gt.f32.partialorder %v2506_v57, 0.0  ;;  %2502 = vst [vmem:[%s2891_s6 + $0x48] sm:$0xff] %v2498_v0  ;;  %v2514_v13 = vmul.f32 0.01, %v2506_v57  ;;  %vm2511_vm10 = vcmp.gt.f32.partialorder %v2507_v22, 0.0 }
 0x37a   : > { %2503 = vst [vmem:[%s2891_s6 + $0x50] sm:$0xff] %v2499_v3  ;;  %v2500_v14 = vsel %vm2492_vm7, %v2488_v55, %v2496_v62  ;;  %v2515_v6 = vmul.f32 0.01, %v2507_v22  ;;  %v2517_v19 = vsel %vm2509_vm8, %v2505_v41, %v2513_v4  ;;  %vm2512_vm11 = vcmp.gt.f32.partialorder %v2508_v63, 0.0 }
 0x37b   : > { %2504 = vst [vmem:[%s2891_s6 + $0x58] sm:$0xff] %v2500_v14  ;;  %v2516_v7 = vmul.f32 0.01, %v2508_v63  ;;  %2521 = vst [vmem:[%s2891_s6 + $0x60] sm:$0xff] %v2517_v19  ;;  %v2518_v8 = vsel %vm2510_vm9, %v2506_v57, %v2514_v13 }
 0x37c   : > { %v2519_v9 = vsel %vm2511_vm10, %v2507_v22, %v2515_v6  ;;  %2522 = vst [vmem:[%s2891_s6 + $0x68] sm:$0xff] %v2518_v8 }
 0x37d   : > { %2523 = vst [vmem:[%s2891_s6 + $0x70] sm:$0xff] %v2519_v9  ;;  %v2520_v10 = vsel %vm2512_vm11, %v2508_v63, %v2516_v7 }
 0x37e   : > { %2524 = vst [vmem:[%s2891_s6 + $0x78] sm:$0xff] %v2520_v10 }
 0x37f PF: > { %s15_s22 = sadd.s32 1, %s2812_s22   ;;  %s3327_s18 = smov %s2804_s20 }
 0x380   : > { %p12_p9 = scmp.ge.s32.totalorder %s15_s22, 10   ;;  %s3328_s19 = smov %s2808_s21 }
 0x381   : > { %s3329_s20 = smov %s3332_s23  ;;  %s3330_s21 = smov %s3336_s24 }
 0x382   :  { %14 = sbr.rel (!%p12_p9) target bundleno = 3 (0x3), region = 98 }

</bundles_post_ra>
